<compile_context>
chip_gen: v7x
topology: tpu7x:2x2x1
jax: 0.10.0
libtpu: 0.0.40
codegen_flags: <defaults>
</compile_context>

<pallas_src>
import functools
import math

import jax
import jax.numpy as jnp
from jax.experimental import pallas as pl
from jax.experimental.pallas import tpu as pltpu


PAD = 128  # lane padding for all feature / latent widths


# --------------------------------------------------------------------------------------
# Small helpers
# --------------------------------------------------------------------------------------

def _round_up(v, m):
    return ((v + m - 1) // m) * m


def _pad2d(a, rows, cols, dtype=None):
    dtype = dtype or a.dtype
    out = jnp.zeros((rows, cols), dtype)
    return out.at[: a.shape[0], : a.shape[1]].set(a.astype(dtype))


# --------------------------------------------------------------------------------------
# Fused encoder-stack kernel  (all three Encoders of the ADGGM in one pallas_call)
# --------------------------------------------------------------------------------------

def _adggm_fused_kernel(ahat_ref, x_ref, y_ref, eps_a_ref, eps_z_ref, eps_pa_ref,
                        w_ref, b_ref, out_ref, *, cfgs, scaling_factor):
    ahat = ahat_ref[...]                       # (Np, Np) bf16 — MXU operand
    xp = x_ref[...]                            # (Np, 128) f32, zero-padded lanes
    yp = y_ref[...]

    def matmul_terms(terms, w_idxs):
        # X @ W with the row-split weight:  sum_k  term_k @ W_k   (bf16 MXU, f32 acc)
        acc = None
        for t, wi in zip(terms, w_idxs):
            r = jnp.dot(t.astype(jnp.bfloat16), w_ref[wi],
                        preferred_element_type=jnp.float32)
            acc = r if acc is None else acc + r
        return acc

    def gcn(terms, w_idxs, b_idx, act=None):
        xw = matmul_terms(terms, w_idxs)                                   # (Np, 128) f32
        h = jnp.dot(ahat, xw.astype(jnp.bfloat16),                         # Ahat @ (X W)
                    preferred_element_type=jnp.float32)
        h = h + b_ref[b_idx:b_idx + 1, :]                                  # bias (f32)
        if act == "relu":
            h = jnp.maximum(h, 0.0)
        elif act == "softplus":
            h = jax.nn.softplus(h)
        return h

    def run_encoder(cfg, in_terms, eps):
        h_terms = in_terms
        nlayers = len(cfg["layers"])
        for k, layer in enumerate(cfg["layers"]):
            h = gcn(h_terms, layer["w"], layer["b"], act="relu")
            if k < nlayers - 1:
                # eval-mode dropout = identity; F.normalize(p=2, dim=1) * scaling_factor
                ss = jnp.sum(h * h, axis=-1, keepdims=True)
                h = h * jax.lax.rsqrt(jnp.maximum(ss, 1e-24)) * scaling_factor
            h_terms = [h]
        h = h_terms[0]
        mu = gcn([h], [cfg["mu"]["w"]], cfg["mu"]["b"], act=None)
        lv = gcn([h], [cfg["lv"]["w"]], cfg["lv"]["b"], act="softplus")
        z = mu + eps * jnp.exp(0.5 * lv)
        return z, mu, lv

    # q(a | x)
    qa, qa_mu, qa_lv = run_encoder(cfgs[0], [xp], eps_a_ref[...])
    # q(z | x, y, a)
    z, z_mu, z_lv = run_encoder(cfgs[1], [xp, yp, qa], eps_z_ref[...])
    # p(a | x, y, z)
    pa, pa_mu, pa_lv = run_encoder(cfgs[2], [xp, yp, z], eps_pa_ref[...])

    out_ref[0, :, :] = qa
    out_ref[1, :, :] = qa_mu
    out_ref[2, :, :] = qa_lv
    out_ref[3, :, :] = z
    out_ref[4, :, :] = z_mu
    out_ref[5, :, :] = z_lv
    out_ref[6, :, :] = pa
    out_ref[7, :, :] = pa_mu
    out_ref[8, :, :] = pa_lv


def _fused_encoders(ahat, x, y, eps_a, eps_z, eps_pa, w_stack, b_stack,
                    cfgs, scaling_factor, n_pad):
    kernel = functools.partial(_adggm_fused_kernel, cfgs=cfgs,
                               scaling_factor=scaling_factor)

    def full_spec(shape):
        nd = len(shape)
        return pl.BlockSpec(shape, lambda i, _nd=nd: (0,) * _nd)

    return pl.pallas_call(
        kernel,
        out_shape=jax.ShapeDtypeStruct((9, n_pad, PAD), jnp.float32),
        grid=(1,),
        in_specs=[full_spec(ahat.shape), full_spec(x.shape), full_spec(y.shape),
                  full_spec(eps_a.shape), full_spec(eps_z.shape), full_spec(eps_pa.shape),
                  full_spec(w_stack.shape), full_spec(b_stack.shape)],
        out_specs=full_spec((9, n_pad, PAD)),
        compiler_params=pltpu.CompilerParams(
            dimension_semantics=("arbitrary",),
            vmem_limit_bytes=64 << 20),
    )(ahat, x, y, eps_a, eps_z, eps_pa, w_stack, b_stack)


# --------------------------------------------------------------------------------------
# Inner-product decoder kernel (edges on lanes -> lane-dense stores)
# --------------------------------------------------------------------------------------

def _decoder_kernel(zs_ref, zd_ref, o_ref):
    # operands: (L_pad, E_pad); reduce over latent (sublane) axis, edges stay on lanes
    v = jnp.sum(zs_ref[...] * zd_ref[...], axis=0, keepdims=True)    # (1, E_pad)
    o_ref[...] = jax.nn.sigmoid(v)


def inner_product_decoder(latent, edge_index):
    e = edge_index.shape[1]
    lat = latent.shape[1]
    l_pad = _round_up(lat, 8)
    e_pad = _round_up(e, 128)

    zs = latent[edge_index[0]]            # (E, L)  gather glue in JAX
    zd = latent[edge_index[1]]
    zs_t = _pad2d(zs.T, l_pad, e_pad)     # (L_pad, E_pad) — edges -> lanes
    zd_t = _pad2d(zd.T, l_pad, e_pad)

    out = pl.pallas_call(
        _decoder_kernel,
        out_shape=jax.ShapeDtypeStruct((1, e_pad), jnp.float32),
        grid=(1,),
        in_specs=[pl.BlockSpec((l_pad, e_pad), lambda i: (0, 0)),
                  pl.BlockSpec((l_pad, e_pad), lambda i: (0, 0))],
        out_specs=pl.BlockSpec((1, e_pad), lambda i: (0, 0)),
        compiler_params=pltpu.CompilerParams(dimension_semantics=("arbitrary",)),
    )(zs_t, zd_t)
    return out[0, :e]


# --------------------------------------------------------------------------------------
# Parameters: logical (PyTorch-shaped) init + packing into lane-padded stacks
# --------------------------------------------------------------------------------------

def xavier_normal(key, fin, fout):
    std = math.sqrt(2.0 / (fin + fout))
    return (std * jax.random.normal(key, (fin, fout))).astype(jnp.float32)


def make_encoder_params(key, in_splits, h_dims, z_dim):
    """in_splits: widths of the input terms whose concatenation feeds the first GCN layer."""
    fin0 = sum(in_splits)
    dims = [fin0] + list(h_dims)
    keys = jax.random.split(key, (len(dims) - 1) + 2)

    layers = []
    # first hidden layer: xavier on the full concatenated fan-in, then split by input term rows
    w0 = xavier_normal(keys[0], dims[0], dims[1])
    splits, off = [], 0
    for s in in_splits:
        splits.append(w0[off:off + s, :])
        off += s
    layers.append({"w": splits, "b": jnp.zeros((dims[1],), jnp.float32)})
    for i in range(2, len(dims)):
        layers.append({"w": [xavier_normal(keys[i - 1], dims[i - 1], dims[i])],
                       "b": jnp.zeros((dims[i],), jnp.float32)})
    mu = {"w": [xavier_normal(keys[-2], dims[-1], z_dim)],
          "b": jnp.zeros((z_dim,), jnp.float32)}
    lv = {"w": [xavier_normal(keys[-1], dims[-1], z_dim)],
          "b": jnp.zeros((z_dim,), jnp.float32)}
    return {"layers": layers, "mu": mu, "lv": lv}


def pack_params(encoders_logical):
    """Pack all weights into one (nw,128,128) bf16 stack and biases into a (nb,128) f32 stack;
    return per-encoder cfgs holding the static indices the kernel uses."""
    w_list, b_list, cfgs = [], [], []

    def add_w(w):
        w_list.append(_pad2d(w, PAD, PAD, jnp.bfloat16))
        return len(w_list) - 1

    def add_b(b):
        b_list.append(jnp.zeros((PAD,), jnp.float32).at[: b.shape[0]].set(b))
        return len(b_list) - 1

    for p in encoders_logical:
        cfg = {"layers": []}
        for layer in p["layers"]:
            cfg["layers"].append({"w": [add_w(w) for w in layer["w"]],
                                  "b": add_b(layer["b"])})
        cfg["mu"] = {"w": add_w(p["mu"]["w"][0]), "b": add_b(p["mu"]["b"])}
        cfg["lv"] = {"w": add_w(p["lv"]["w"][0]), "b": add_b(p["lv"]["b"])}
        cfgs.append(cfg)

    w_stack = jnp.stack(w_list)                                   # (nw, 128, 128) bf16
    b_stack = jnp.stack(b_list)                                   # (nb, 128) f32
    nb_pad = _round_up(b_stack.shape[0], 8)
    if nb_pad != b_stack.shape[0]:
        b_stack = jnp.zeros((nb_pad, PAD), jnp.float32).at[: b_stack.shape[0]].set(b_stack)
    return w_stack, b_stack, cfgs


# --------------------------------------------------------------------------------------
# Model composition (plain-JAX glue around the two kernels)
# --------------------------------------------------------------------------------------

def normalized_adjacency(edge_index, n):
    # dense  D^-1/2 (A + I) D^-1/2 ; A[dst, src] = 1 for each edge (src -> dst)
    a = jnp.zeros((n, n), jnp.float32).at[edge_index[1], edge_index[0]].set(1.0)
    a = a + jnp.eye(n, dtype=jnp.float32)
    deg = jnp.sum(a, axis=1)
    dinv = 1.0 / jnp.sqrt(jnp.maximum(deg, 1.0))
    return a * dinv[:, None] * dinv[None, :]


def log_gaussian(x, mu, log_var):
    return jnp.sum(-0.5 * math.log(2 * math.pi) - 0.5 * log_var
                   - (x - mu) ** 2 / (2.0 * jnp.exp(log_var)), axis=-1)


def log_standard_gaussian(x):
    return jnp.sum(-0.5 * math.log(2 * math.pi) - 0.5 * x ** 2, axis=-1)


def adggm_forward(w_stack, b_stack, cfgs, x, y, edge_index, eps_a, eps_z, eps_pa,
                  *, z_dim, a_dim, scaling_factor=1.0):
    n = x.shape[0]
    n_pad = _round_up(n, 8)

    ahat = normalized_adjacency(edge_index, n)
    ahat_p = _pad2d(ahat, n_pad, n_pad, jnp.bfloat16)       # bf16 MXU operand, halves traffic
    x_p = _pad2d(x, n_pad, PAD)
    y_p = _pad2d(y, n_pad, PAD)
    eps_a_p = _pad2d(eps_a, n_pad, PAD)
    eps_z_p = _pad2d(eps_z, n_pad, PAD)
    eps_pa_p = _pad2d(eps_pa, n_pad, PAD)

    stats = _fused_encoders(ahat_p, x_p, y_p, eps_a_p, eps_z_p, eps_pa_p,
                            w_stack, b_stack, cfgs, scaling_factor, n_pad)

    qa, qa_mu, qa_lv = stats[0, :n, :a_dim], stats[1, :n, :a_dim], stats[2, :n, :a_dim]
    z, z_mu, z_lv = stats[3, :n, :z_dim], stats[4, :n, :z_dim], stats[5, :n, :z_dim]
    pa, pa_mu, pa_lv = stats[6, :n, :a_dim], stats[7, :n, :a_dim], stats[8, :n, :a_dim]

    # p(A | y, z, a): inner-product decoder on edge endpoints
    latent = jnp.concatenate([y, z, pa], axis=1)
    A = inner_product_decoder(latent, edge_index)

    # KL bookkeeping (stored as an attribute in the PyTorch module)
    a_kl = log_gaussian(qa, qa_mu, qa_lv) - log_gaussian(qa, pa_mu, pa_lv)
    z_kl = log_gaussian(z, z_mu, z_lv) - log_standard_gaussian(z)
    return A, a_kl + z_kl


# --------------------------------------------------------------------------------------
# Driver
# --------------------------------------------------------------------------------------

if __name__ == "__main__":
    # dims = [x_dim, y_dim, z_dim, a_dim, h_dim]
    N, E = 32, 64
    x_dim, y_dim, z_dim, a_dim = 16, 4, 8, 8
    h_dim = [32, 16]

    key = jax.random.PRNGKey(0)
    (k_x, k_y, k_e1, k_e2, k_p1, k_p2, k_p3,
     k_eps_a, k_eps_z, k_eps_pa) = jax.random.split(key, 10)

    x = jax.random.normal(k_x, (N, x_dim), jnp.float32)
    labels = jax.random.randint(k_y, (N,), 0, y_dim)
    y = jax.nn.one_hot(labels, y_dim, dtype=jnp.float32)
    edge_index = jnp.stack([jax.random.randint(k_e1, (E,), 0, N),
                            jax.random.randint(k_e2, (E,), 0, N)], axis=0)

    encoders_logical = [
        # aux_encoder: Encoder([x_dim, h_dim, a_dim]), input = x
        make_encoder_params(k_p1, (x_dim,), h_dim, a_dim),
        # encoder: Encoder([a_dim + y_dim + x_dim, h_dim, z_dim]), input = cat([x, y, q_a])
        make_encoder_params(k_p2, (x_dim, y_dim, a_dim), h_dim, z_dim),
        # aux_decoder: Encoder([x_dim + z_dim + y_dim, reversed(h_dim), a_dim]), input = cat([x, y, z])
        make_encoder_params(k_p3, (x_dim, y_dim, z_dim), list(reversed(h_dim)), a_dim),
    ]
    w_stack, b_stack, cfgs = pack_params(encoders_logical)

    eps_a = jax.random.normal(k_eps_a, (N, a_dim), jnp.float32)
    eps_z = jax.random.normal(k_eps_z, (N, z_dim), jnp.float32)
    eps_pa = jax.random.normal(k_eps_pa, (N, a_dim), jnp.float32)

    # jit over arrays; the static cfg structure (pure-Python indices) is closed over.
    fwd_jit = jax.jit(lambda w, b, xx, yy, ei, ea, ez, ep:
                      adggm_forward(w, b, cfgs, xx, yy, ei, ea, ez, ep,
                                    z_dim=z_dim, a_dim=a_dim, scaling_factor=1.0))

    A, kl = fwd_jit(w_stack, b_stack, x, y, edge_index, eps_a, eps_z, eps_pa)
    jax.block_until_ready(A)
    jax.block_until_ready(kl)
    assert A.shape == (E,) and kl.shape == (N,)
    assert bool(jnp.all(jnp.isfinite(A))) and bool(jnp.all(jnp.isfinite(kl)))
    print("KERNEL_OK")
</pallas_src>

<mosaic_0001>
module attributes {stable_mosaic.version = 11 : i64} {
  func.func @_adggm_fused_kernel(%arg0: i32, %arg1: memref<32x32xbf16, #tpu.memory_space<vmem>>, %arg2: memref<32x128xf32, #tpu.memory_space<vmem>>, %arg3: memref<32x128xf32, #tpu.memory_space<vmem>>, %arg4: memref<32x128xf32, #tpu.memory_space<vmem>>, %arg5: memref<32x128xf32, #tpu.memory_space<vmem>>, %arg6: memref<32x128xf32, #tpu.memory_space<vmem>>, %arg7: memref<16x128x128xbf16, #tpu.memory_space<vmem>>, %arg8: memref<16x128xf32, #tpu.memory_space<vmem>>, %arg9: memref<9x32x128xf32, #tpu.memory_space<vmem>>) attributes {dimension_semantics = [#tpu.dimension_semantics<arbitrary>], iteration_bounds = array<i64: 1>, scalar_prefetch = 0 : i64, scratch_operands = 0 : i64, tpu.core_type = #tpu.core_type<tc>, window_params = [{pipeline_mode = #tpu.pipeline_mode<synchronous>, transform_indices = @transform_0, window_bounds = array<i64: 32, 32>}, {pipeline_mode = #tpu.pipeline_mode<synchronous>, transform_indices = @transform_1, window_bounds = array<i64: 32, 128>}, {pipeline_mode = #tpu.pipeline_mode<synchronous>, transform_indices = @transform_2, window_bounds = array<i64: 32, 128>}, {pipeline_mode = #tpu.pipeline_mode<synchronous>, transform_indices = @transform_3, window_bounds = array<i64: 32, 128>}, {pipeline_mode = #tpu.pipeline_mode<synchronous>, transform_indices = @transform_4, window_bounds = array<i64: 32, 128>}, {pipeline_mode = #tpu.pipeline_mode<synchronous>, transform_indices = @transform_5, window_bounds = array<i64: 32, 128>}, {pipeline_mode = #tpu.pipeline_mode<synchronous>, transform_indices = @transform_6, window_bounds = array<i64: 16, 128, 128>}, {pipeline_mode = #tpu.pipeline_mode<synchronous>, transform_indices = @transform_7, window_bounds = array<i64: 16, 128>}, {pipeline_mode = #tpu.pipeline_mode<synchronous>, transform_indices = @transform_8, window_bounds = array<i64: 9, 32, 128>}]} {
    %c0 = arith.constant 0 : index
    %c0_0 = arith.constant 0 : index
    %0 = vector.load %arg1[%c0, %c0_0] : memref<32x32xbf16, #tpu.memory_space<vmem>>, vector<32x32xbf16>
    %c0_1 = arith.constant 0 : index
    %c0_2 = arith.constant 0 : index
    %1 = vector.load %arg2[%c0_1, %c0_2] : memref<32x128xf32, #tpu.memory_space<vmem>>, vector<32x128xf32>
    %c0_3 = arith.constant 0 : index
    %c0_4 = arith.constant 0 : index
    %2 = vector.load %arg3[%c0_3, %c0_4] : memref<32x128xf32, #tpu.memory_space<vmem>>, vector<32x128xf32>
    %c0_5 = arith.constant 0 : index
    %c0_6 = arith.constant 0 : index
    %3 = vector.load %arg4[%c0_5, %c0_6] : memref<32x128xf32, #tpu.memory_space<vmem>>, vector<32x128xf32>
    %4 = arith.truncf %1 : vector<32x128xf32> to vector<32x128xbf16>
    %c0_7 = arith.constant 0 : index
    %c0_8 = arith.constant 0 : index
    %c0_9 = arith.constant 0 : index
    %5 = vector.load %arg7[%c0_7, %c0_8, %c0_9] : memref<16x128x128xbf16, #tpu.memory_space<vmem>>, vector<1x128x128xbf16>
    %6 = vector.shape_cast %5 : vector<1x128x128xbf16> to vector<128x128xbf16>
    %cst = arith.constant dense<0.000000e+00> : vector<32x128xf32>
    %7 = tpu.matmul %4, %6, %cst {dimension_numbers = #tpu.dot_dimension_numbers<[1], [0], [0], [1], [0, 0, 1, 1], [], []>} : vector<32x128xbf16>, vector<128x128xbf16>, vector<32x128xf32> -> vector<32x128xf32>
    %8 = arith.truncf %7 : vector<32x128xf32> to vector<32x128xbf16>
    %cst_10 = arith.constant dense<0.000000e+00> : vector<32x128xf32>
    %9 = tpu.matmul %0, %8, %cst_10 {dimension_numbers = #tpu.dot_dimension_numbers<[1], [0], [0], [1], [0, 0, 1, 1], [], []>} : vector<32x32xbf16>, vector<32x128xbf16>, vector<32x128xf32> -> vector<32x128xf32>
    %c0_11 = arith.constant 0 : index
    %c0_12 = arith.constant 0 : index
    %10 = vector.load %arg8[%c0_11, %c0_12] : memref<16x128xf32, #tpu.memory_space<vmem>>, vector<1x128xf32>
    %11 = vector.broadcast %10 : vector<1x128xf32> to vector<32x128xf32>
    %12 = arith.addf %9, %11 : vector<32x128xf32>
    %cst_13 = arith.constant 0.000000e+00 : f32
    %13 = vector.broadcast %cst_13 : f32 to vector<32x128xf32>
    %14 = arith.maximumf %12, %13 : vector<32x128xf32>
    %15 = arith.mulf %14, %14 : vector<32x128xf32>
    %cst_14 = arith.constant dense<0.000000e+00> : vector<32xf32>
    %16 = vector.multi_reduction <add>, %15, %cst_14 [1] : vector<32x128xf32> to vector<32xf32>
    %17 = vector.shape_cast %16 : vector<32xf32> to vector<32x1xf32>
    %cst_15 = arith.constant 1.000000e-24 : f32
    %18 = vector.broadcast %cst_15 : f32 to vector<32x1xf32>
    %19 = arith.maximumf %17, %18 : vector<32x1xf32>
    %20 = math.rsqrt %19 : vector<32x1xf32>
    %21 = vector.broadcast %20 : vector<32x1xf32> to vector<32x128xf32>
    %22 = arith.mulf %14, %21 : vector<32x128xf32>
    %cst_16 = arith.constant 1.000000e+00 : f32
    %23 = vector.broadcast %cst_16 : f32 to vector<32x128xf32>
    %24 = arith.mulf %22, %23 : vector<32x128xf32>
    %25 = arith.truncf %24 : vector<32x128xf32> to vector<32x128xbf16>
    %c1 = arith.constant 1 : index
    %c0_17 = arith.constant 0 : index
    %c0_18 = arith.constant 0 : index
    %26 = vector.load %arg7[%c1, %c0_17, %c0_18] : memref<16x128x128xbf16, #tpu.memory_space<vmem>>, vector<1x128x128xbf16>
    %27 = vector.shape_cast %26 : vector<1x128x128xbf16> to vector<128x128xbf16>
    %cst_19 = arith.constant dense<0.000000e+00> : vector<32x128xf32>
    %28 = tpu.matmul %25, %27, %cst_19 {dimension_numbers = #tpu.dot_dimension_numbers<[1], [0], [0], [1], [0, 0, 1, 1], [], []>} : vector<32x128xbf16>, vector<128x128xbf16>, vector<32x128xf32> -> vector<32x128xf32>
    %29 = arith.truncf %28 : vector<32x128xf32> to vector<32x128xbf16>
    %cst_20 = arith.constant dense<0.000000e+00> : vector<32x128xf32>
    %30 = tpu.matmul %0, %29, %cst_20 {dimension_numbers = #tpu.dot_dimension_numbers<[1], [0], [0], [1], [0, 0, 1, 1], [], []>} : vector<32x32xbf16>, vector<32x128xbf16>, vector<32x128xf32> -> vector<32x128xf32>
    %c1_21 = arith.constant 1 : index
    %c0_22 = arith.constant 0 : index
    %31 = vector.load %arg8[%c1_21, %c0_22] : memref<16x128xf32, #tpu.memory_space<vmem>>, vector<1x128xf32>
    %32 = vector.broadcast %31 : vector<1x128xf32> to vector<32x128xf32>
    %33 = arith.addf %30, %32 : vector<32x128xf32>
    %cst_23 = arith.constant 0.000000e+00 : f32
    %34 = vector.broadcast %cst_23 : f32 to vector<32x128xf32>
    %35 = arith.maximumf %33, %34 : vector<32x128xf32>
    %36 = arith.truncf %35 : vector<32x128xf32> to vector<32x128xbf16>
    %c2 = arith.constant 2 : index
    %c0_24 = arith.constant 0 : index
    %c0_25 = arith.constant 0 : index
    %37 = vector.load %arg7[%c2, %c0_24, %c0_25] : memref<16x128x128xbf16, #tpu.memory_space<vmem>>, vector<1x128x128xbf16>
    %38 = vector.shape_cast %37 : vector<1x128x128xbf16> to vector<128x128xbf16>
    %cst_26 = arith.constant dense<0.000000e+00> : vector<32x128xf32>
    %39 = tpu.matmul %36, %38, %cst_26 {dimension_numbers = #tpu.dot_dimension_numbers<[1], [0], [0], [1], [0, 0, 1, 1], [], []>} : vector<32x128xbf16>, vector<128x128xbf16>, vector<32x128xf32> -> vector<32x128xf32>
    %40 = arith.truncf %39 : vector<32x128xf32> to vector<32x128xbf16>
    %cst_27 = arith.constant dense<0.000000e+00> : vector<32x128xf32>
    %41 = tpu.matmul %0, %40, %cst_27 {dimension_numbers = #tpu.dot_dimension_numbers<[1], [0], [0], [1], [0, 0, 1, 1], [], []>} : vector<32x32xbf16>, vector<32x128xbf16>, vector<32x128xf32> -> vector<32x128xf32>
    %c2_28 = arith.constant 2 : index
    %c0_29 = arith.constant 0 : index
    %42 = vector.load %arg8[%c2_28, %c0_29] : memref<16x128xf32, #tpu.memory_space<vmem>>, vector<1x128xf32>
    %43 = vector.broadcast %42 : vector<1x128xf32> to vector<32x128xf32>
    %44 = arith.addf %41, %43 : vector<32x128xf32>
    %45 = arith.truncf %35 : vector<32x128xf32> to vector<32x128xbf16>
    %c3 = arith.constant 3 : index
    %c0_30 = arith.constant 0 : index
    %c0_31 = arith.constant 0 : index
    %46 = vector.load %arg7[%c3, %c0_30, %c0_31] : memref<16x128x128xbf16, #tpu.memory_space<vmem>>, vector<1x128x128xbf16>
    %47 = vector.shape_cast %46 : vector<1x128x128xbf16> to vector<128x128xbf16>
    %cst_32 = arith.constant dense<0.000000e+00> : vector<32x128xf32>
    %48 = tpu.matmul %45, %47, %cst_32 {dimension_numbers = #tpu.dot_dimension_numbers<[1], [0], [0], [1], [0, 0, 1, 1], [], []>} : vector<32x128xbf16>, vector<128x128xbf16>, vector<32x128xf32> -> vector<32x128xf32>
    %49 = arith.truncf %48 : vector<32x128xf32> to vector<32x128xbf16>
    %cst_33 = arith.constant dense<0.000000e+00> : vector<32x128xf32>
    %50 = tpu.matmul %0, %49, %cst_33 {dimension_numbers = #tpu.dot_dimension_numbers<[1], [0], [0], [1], [0, 0, 1, 1], [], []>} : vector<32x32xbf16>, vector<32x128xbf16>, vector<32x128xf32> -> vector<32x128xf32>
    %c3_34 = arith.constant 3 : index
    %c0_35 = arith.constant 0 : index
    %51 = vector.load %arg8[%c3_34, %c0_35] : memref<16x128xf32, #tpu.memory_space<vmem>>, vector<1x128xf32>
    %52 = vector.broadcast %51 : vector<1x128xf32> to vector<32x128xf32>
    %53 = arith.addf %50, %52 : vector<32x128xf32>
    %cst_36 = arith.constant 0.000000e+00 : f32
    %54 = vector.broadcast %cst_36 : f32 to vector<32x128xf32>
    %55 = arith.maximumf %53, %54 : vector<32x128xf32>
    %56 = vector.broadcast %cst_36 : f32 to vector<32x128xf32>
    %57 = arith.subf %53, %56 : vector<32x128xf32>
    %58 = arith.cmpf one, %57, %57 : vector<32x128xf32>
    %59 = vector.broadcast %cst_36 : f32 to vector<32x128xf32>
    %60 = arith.addf %53, %59 : vector<32x128xf32>
    %61 = math.absf %57 : vector<32x128xf32>
    %cst_37 = arith.constant 0.000000e+00 : f32
    %62 = vector.broadcast %cst_37 : f32 to vector<32x128xf32>
    %63 = arith.subf %62, %61 : vector<32x128xf32>
    %64 = math.exp %63 : vector<32x128xf32>
    %65 = math.log1p %64 : vector<32x128xf32>
    %66 = arith.addf %55, %65 : vector<32x128xf32>
    %67 = arith.select %58, %60, %66 : vector<32x128xi1>, vector<32x128xf32>
    %cst_38 = arith.constant 5.000000e-01 : f32
    %68 = vector.broadcast %cst_38 : f32 to vector<32x128xf32>
    %69 = arith.mulf %68, %67 : vector<32x128xf32>
    %70 = math.exp %69 : vector<32x128xf32>
    %71 = arith.mulf %3, %70 : vector<32x128xf32>
    %72 = arith.addf %44, %71 : vector<32x128xf32>
    %c0_39 = arith.constant 0 : index
    %c0_40 = arith.constant 0 : index
    %73 = vector.load %arg5[%c0_39, %c0_40] : memref<32x128xf32, #tpu.memory_space<vmem>>, vector<32x128xf32>
    %74 = arith.truncf %1 : vector<32x128xf32> to vector<32x128xbf16>
    %c4 = arith.constant 4 : index
    %c0_41 = arith.constant 0 : index
    %c0_42 = arith.constant 0 : index
    %75 = vector.load %arg7[%c4, %c0_41, %c0_42] : memref<16x128x128xbf16, #tpu.memory_space<vmem>>, vector<1x128x128xbf16>
    %76 = vector.shape_cast %75 : vector<1x128x128xbf16> to vector<128x128xbf16>
    %cst_43 = arith.constant dense<0.000000e+00> : vector<32x128xf32>
    %77 = tpu.matmul %74, %76, %cst_43 {dimension_numbers = #tpu.dot_dimension_numbers<[1], [0], [0], [1], [0, 0, 1, 1], [], []>} : vector<32x128xbf16>, vector<128x128xbf16>, vector<32x128xf32> -> vector<32x128xf32>
    %78 = arith.truncf %2 : vector<32x128xf32> to vector<32x128xbf16>
    %c5 = arith.constant 5 : index
    %c0_44 = arith.constant 0 : index
    %c0_45 = arith.constant 0 : index
    %79 = vector.load %arg7[%c5, %c0_44, %c0_45] : memref<16x128x128xbf16, #tpu.memory_space<vmem>>, vector<1x128x128xbf16>
    %80 = vector.shape_cast %79 : vector<1x128x128xbf16> to vector<128x128xbf16>
    %cst_46 = arith.constant dense<0.000000e+00> : vector<32x128xf32>
    %81 = tpu.matmul %78, %80, %cst_46 {dimension_numbers = #tpu.dot_dimension_numbers<[1], [0], [0], [1], [0, 0, 1, 1], [], []>} : vector<32x128xbf16>, vector<128x128xbf16>, vector<32x128xf32> -> vector<32x128xf32>
    %82 = arith.addf %77, %81 : vector<32x128xf32>
    %83 = arith.truncf %72 : vector<32x128xf32> to vector<32x128xbf16>
    %c6 = arith.constant 6 : index
    %c0_47 = arith.constant 0 : index
    %c0_48 = arith.constant 0 : index
    %84 = vector.load %arg7[%c6, %c0_47, %c0_48] : memref<16x128x128xbf16, #tpu.memory_space<vmem>>, vector<1x128x128xbf16>
    %85 = vector.shape_cast %84 : vector<1x128x128xbf16> to vector<128x128xbf16>
    %cst_49 = arith.constant dense<0.000000e+00> : vector<32x128xf32>
    %86 = tpu.matmul %83, %85, %cst_49 {dimension_numbers = #tpu.dot_dimension_numbers<[1], [0], [0], [1], [0, 0, 1, 1], [], []>} : vector<32x128xbf16>, vector<128x128xbf16>, vector<32x128xf32> -> vector<32x128xf32>
    %87 = arith.addf %82, %86 : vector<32x128xf32>
    %88 = arith.truncf %87 : vector<32x128xf32> to vector<32x128xbf16>
    %cst_50 = arith.constant dense<0.000000e+00> : vector<32x128xf32>
    %89 = tpu.matmul %0, %88, %cst_50 {dimension_numbers = #tpu.dot_dimension_numbers<[1], [0], [0], [1], [0, 0, 1, 1], [], []>} : vector<32x32xbf16>, vector<32x128xbf16>, vector<32x128xf32> -> vector<32x128xf32>
    %c4_51 = arith.constant 4 : index
    %c0_52 = arith.constant 0 : index
    %90 = vector.load %arg8[%c4_51, %c0_52] : memref<16x128xf32, #tpu.memory_space<vmem>>, vector<1x128xf32>
    %91 = vector.broadcast %90 : vector<1x128xf32> to vector<32x128xf32>
    %92 = arith.addf %89, %91 : vector<32x128xf32>
    %cst_53 = arith.constant 0.000000e+00 : f32
    %93 = vector.broadcast %cst_53 : f32 to vector<32x128xf32>
    %94 = arith.maximumf %92, %93 : vector<32x128xf32>
    %95 = arith.mulf %94, %94 : vector<32x128xf32>
    %cst_54 = arith.constant dense<0.000000e+00> : vector<32xf32>
    %96 = vector.multi_reduction <add>, %95, %cst_54 [1] : vector<32x128xf32> to vector<32xf32>
    %97 = vector.shape_cast %96 : vector<32xf32> to vector<32x1xf32>
    %cst_55 = arith.constant 1.000000e-24 : f32
    %98 = vector.broadcast %cst_55 : f32 to vector<32x1xf32>
    %99 = arith.maximumf %97, %98 : vector<32x1xf32>
    %100 = math.rsqrt %99 : vector<32x1xf32>
    %101 = vector.broadcast %100 : vector<32x1xf32> to vector<32x128xf32>
    %102 = arith.mulf %94, %101 : vector<32x128xf32>
    %cst_56 = arith.constant 1.000000e+00 : f32
    %103 = vector.broadcast %cst_56 : f32 to vector<32x128xf32>
    %104 = arith.mulf %102, %103 : vector<32x128xf32>
    %105 = arith.truncf %104 : vector<32x128xf32> to vector<32x128xbf16>
    %c7 = arith.constant 7 : index
    %c0_57 = arith.constant 0 : index
    %c0_58 = arith.constant 0 : index
    %106 = vector.load %arg7[%c7, %c0_57, %c0_58] : memref<16x128x128xbf16, #tpu.memory_space<vmem>>, vector<1x128x128xbf16>
    %107 = vector.shape_cast %106 : vector<1x128x128xbf16> to vector<128x128xbf16>
    %cst_59 = arith.constant dense<0.000000e+00> : vector<32x128xf32>
    %108 = tpu.matmul %105, %107, %cst_59 {dimension_numbers = #tpu.dot_dimension_numbers<[1], [0], [0], [1], [0, 0, 1, 1], [], []>} : vector<32x128xbf16>, vector<128x128xbf16>, vector<32x128xf32> -> vector<32x128xf32>
    %109 = arith.truncf %108 : vector<32x128xf32> to vector<32x128xbf16>
    %cst_60 = arith.constant dense<0.000000e+00> : vector<32x128xf32>
    %110 = tpu.matmul %0, %109, %cst_60 {dimension_numbers = #tpu.dot_dimension_numbers<[1], [0], [0], [1], [0, 0, 1, 1], [], []>} : vector<32x32xbf16>, vector<32x128xbf16>, vector<32x128xf32> -> vector<32x128xf32>
    %c5_61 = arith.constant 5 : index
    %c0_62 = arith.constant 0 : index
    %111 = vector.load %arg8[%c5_61, %c0_62] : memref<16x128xf32, #tpu.memory_space<vmem>>, vector<1x128xf32>
    %112 = vector.broadcast %111 : vector<1x128xf32> to vector<32x128xf32>
    %113 = arith.addf %110, %112 : vector<32x128xf32>
    %cst_63 = arith.constant 0.000000e+00 : f32
    %114 = vector.broadcast %cst_63 : f32 to vector<32x128xf32>
    %115 = arith.maximumf %113, %114 : vector<32x128xf32>
    %116 = arith.truncf %115 : vector<32x128xf32> to vector<32x128xbf16>
    %c8 = arith.constant 8 : index
    %c0_64 = arith.constant 0 : index
    %c0_65 = arith.constant 0 : index
    %117 = vector.load %arg7[%c8, %c0_64, %c0_65] : memref<16x128x128xbf16, #tpu.memory_space<vmem>>, vector<1x128x128xbf16>
    %118 = vector.shape_cast %117 : vector<1x128x128xbf16> to vector<128x128xbf16>
    %cst_66 = arith.constant dense<0.000000e+00> : vector<32x128xf32>
    %119 = tpu.matmul %116, %118, %cst_66 {dimension_numbers = #tpu.dot_dimension_numbers<[1], [0], [0], [1], [0, 0, 1, 1], [], []>} : vector<32x128xbf16>, vector<128x128xbf16>, vector<32x128xf32> -> vector<32x128xf32>
    %120 = arith.truncf %119 : vector<32x128xf32> to vector<32x128xbf16>
    %cst_67 = arith.constant dense<0.000000e+00> : vector<32x128xf32>
    %121 = tpu.matmul %0, %120, %cst_67 {dimension_numbers = #tpu.dot_dimension_numbers<[1], [0], [0], [1], [0, 0, 1, 1], [], []>} : vector<32x32xbf16>, vector<32x128xbf16>, vector<32x128xf32> -> vector<32x128xf32>
    %c6_68 = arith.constant 6 : index
    %c0_69 = arith.constant 0 : index
    %122 = vector.load %arg8[%c6_68, %c0_69] : memref<16x128xf32, #tpu.memory_space<vmem>>, vector<1x128xf32>
    %123 = vector.broadcast %122 : vector<1x128xf32> to vector<32x128xf32>
    %124 = arith.addf %121, %123 : vector<32x128xf32>
    %125 = arith.truncf %115 : vector<32x128xf32> to vector<32x128xbf16>
    %c9 = arith.constant 9 : index
    %c0_70 = arith.constant 0 : index
    %c0_71 = arith.constant 0 : index
    %126 = vector.load %arg7[%c9, %c0_70, %c0_71] : memref<16x128x128xbf16, #tpu.memory_space<vmem>>, vector<1x128x128xbf16>
    %127 = vector.shape_cast %126 : vector<1x128x128xbf16> to vector<128x128xbf16>
    %cst_72 = arith.constant dense<0.000000e+00> : vector<32x128xf32>
    %128 = tpu.matmul %125, %127, %cst_72 {dimension_numbers = #tpu.dot_dimension_numbers<[1], [0], [0], [1], [0, 0, 1, 1], [], []>} : vector<32x128xbf16>, vector<128x128xbf16>, vector<32x128xf32> -> vector<32x128xf32>
    %129 = arith.truncf %128 : vector<32x128xf32> to vector<32x128xbf16>
    %cst_73 = arith.constant dense<0.000000e+00> : vector<32x128xf32>
    %130 = tpu.matmul %0, %129, %cst_73 {dimension_numbers = #tpu.dot_dimension_numbers<[1], [0], [0], [1], [0, 0, 1, 1], [], []>} : vector<32x32xbf16>, vector<32x128xbf16>, vector<32x128xf32> -> vector<32x128xf32>
    %c7_74 = arith.constant 7 : index
    %c0_75 = arith.constant 0 : index
    %131 = vector.load %arg8[%c7_74, %c0_75] : memref<16x128xf32, #tpu.memory_space<vmem>>, vector<1x128xf32>
    %132 = vector.broadcast %131 : vector<1x128xf32> to vector<32x128xf32>
    %133 = arith.addf %130, %132 : vector<32x128xf32>
    %cst_76 = arith.constant 0.000000e+00 : f32
    %134 = vector.broadcast %cst_76 : f32 to vector<32x128xf32>
    %135 = arith.maximumf %133, %134 : vector<32x128xf32>
    %136 = vector.broadcast %cst_76 : f32 to vector<32x128xf32>
    %137 = arith.subf %133, %136 : vector<32x128xf32>
    %138 = arith.cmpf one, %137, %137 : vector<32x128xf32>
    %139 = vector.broadcast %cst_76 : f32 to vector<32x128xf32>
    %140 = arith.addf %133, %139 : vector<32x128xf32>
    %141 = math.absf %137 : vector<32x128xf32>
    %cst_77 = arith.constant 0.000000e+00 : f32
    %142 = vector.broadcast %cst_77 : f32 to vector<32x128xf32>
    %143 = arith.subf %142, %141 : vector<32x128xf32>
    %144 = math.exp %143 : vector<32x128xf32>
    %145 = math.log1p %144 : vector<32x128xf32>
    %146 = arith.addf %135, %145 : vector<32x128xf32>
    %147 = arith.select %138, %140, %146 : vector<32x128xi1>, vector<32x128xf32>
    %cst_78 = arith.constant 5.000000e-01 : f32
    %148 = vector.broadcast %cst_78 : f32 to vector<32x128xf32>
    %149 = arith.mulf %148, %147 : vector<32x128xf32>
    %150 = math.exp %149 : vector<32x128xf32>
    %151 = arith.mulf %73, %150 : vector<32x128xf32>
    %152 = arith.addf %124, %151 : vector<32x128xf32>
    %c0_79 = arith.constant 0 : index
    %c0_80 = arith.constant 0 : index
    %153 = vector.load %arg6[%c0_79, %c0_80] : memref<32x128xf32, #tpu.memory_space<vmem>>, vector<32x128xf32>
    %154 = arith.truncf %1 : vector<32x128xf32> to vector<32x128xbf16>
    %c10 = arith.constant 10 : index
    %c0_81 = arith.constant 0 : index
    %c0_82 = arith.constant 0 : index
    %155 = vector.load %arg7[%c10, %c0_81, %c0_82] : memref<16x128x128xbf16, #tpu.memory_space<vmem>>, vector<1x128x128xbf16>
    %156 = vector.shape_cast %155 : vector<1x128x128xbf16> to vector<128x128xbf16>
    %cst_83 = arith.constant dense<0.000000e+00> : vector<32x128xf32>
    %157 = tpu.matmul %154, %156, %cst_83 {dimension_numbers = #tpu.dot_dimension_numbers<[1], [0], [0], [1], [0, 0, 1, 1], [], []>} : vector<32x128xbf16>, vector<128x128xbf16>, vector<32x128xf32> -> vector<32x128xf32>
    %158 = arith.truncf %2 : vector<32x128xf32> to vector<32x128xbf16>
    %c11 = arith.constant 11 : index
    %c0_84 = arith.constant 0 : index
    %c0_85 = arith.constant 0 : index
    %159 = vector.load %arg7[%c11, %c0_84, %c0_85] : memref<16x128x128xbf16, #tpu.memory_space<vmem>>, vector<1x128x128xbf16>
    %160 = vector.shape_cast %159 : vector<1x128x128xbf16> to vector<128x128xbf16>
    %cst_86 = arith.constant dense<0.000000e+00> : vector<32x128xf32>
    %161 = tpu.matmul %158, %160, %cst_86 {dimension_numbers = #tpu.dot_dimension_numbers<[1], [0], [0], [1], [0, 0, 1, 1], [], []>} : vector<32x128xbf16>, vector<128x128xbf16>, vector<32x128xf32> -> vector<32x128xf32>
    %162 = arith.addf %157, %161 : vector<32x128xf32>
    %163 = arith.truncf %152 : vector<32x128xf32> to vector<32x128xbf16>
    %c12 = arith.constant 12 : index
    %c0_87 = arith.constant 0 : index
    %c0_88 = arith.constant 0 : index
    %164 = vector.load %arg7[%c12, %c0_87, %c0_88] : memref<16x128x128xbf16, #tpu.memory_space<vmem>>, vector<1x128x128xbf16>
    %165 = vector.shape_cast %164 : vector<1x128x128xbf16> to vector<128x128xbf16>
    %cst_89 = arith.constant dense<0.000000e+00> : vector<32x128xf32>
    %166 = tpu.matmul %163, %165, %cst_89 {dimension_numbers = #tpu.dot_dimension_numbers<[1], [0], [0], [1], [0, 0, 1, 1], [], []>} : vector<32x128xbf16>, vector<128x128xbf16>, vector<32x128xf32> -> vector<32x128xf32>
    %167 = arith.addf %162, %166 : vector<32x128xf32>
    %168 = arith.truncf %167 : vector<32x128xf32> to vector<32x128xbf16>
    %cst_90 = arith.constant dense<0.000000e+00> : vector<32x128xf32>
    %169 = tpu.matmul %0, %168, %cst_90 {dimension_numbers = #tpu.dot_dimension_numbers<[1], [0], [0], [1], [0, 0, 1, 1], [], []>} : vector<32x32xbf16>, vector<32x128xbf16>, vector<32x128xf32> -> vector<32x128xf32>
    %c8_91 = arith.constant 8 : index
    %c0_92 = arith.constant 0 : index
    %170 = vector.load %arg8[%c8_91, %c0_92] : memref<16x128xf32, #tpu.memory_space<vmem>>, vector<1x128xf32>
    %171 = vector.broadcast %170 : vector<1x128xf32> to vector<32x128xf32>
    %172 = arith.addf %169, %171 : vector<32x128xf32>
    %cst_93 = arith.constant 0.000000e+00 : f32
    %173 = vector.broadcast %cst_93 : f32 to vector<32x128xf32>
    %174 = arith.maximumf %172, %173 : vector<32x128xf32>
    %175 = arith.mulf %174, %174 : vector<32x128xf32>
    %cst_94 = arith.constant dense<0.000000e+00> : vector<32xf32>
    %176 = vector.multi_reduction <add>, %175, %cst_94 [1] : vector<32x128xf32> to vector<32xf32>
    %177 = vector.shape_cast %176 : vector<32xf32> to vector<32x1xf32>
    %cst_95 = arith.constant 1.000000e-24 : f32
    %178 = vector.broadcast %cst_95 : f32 to vector<32x1xf32>
    %179 = arith.maximumf %177, %178 : vector<32x1xf32>
    %180 = math.rsqrt %179 : vector<32x1xf32>
    %181 = vector.broadcast %180 : vector<32x1xf32> to vector<32x128xf32>
    %182 = arith.mulf %174, %181 : vector<32x128xf32>
    %cst_96 = arith.constant 1.000000e+00 : f32
    %183 = vector.broadcast %cst_96 : f32 to vector<32x128xf32>
    %184 = arith.mulf %182, %183 : vector<32x128xf32>
    %185 = arith.truncf %184 : vector<32x128xf32> to vector<32x128xbf16>
    %c13 = arith.constant 13 : index
    %c0_97 = arith.constant 0 : index
    %c0_98 = arith.constant 0 : index
    %186 = vector.load %arg7[%c13, %c0_97, %c0_98] : memref<16x128x128xbf16, #tpu.memory_space<vmem>>, vector<1x128x128xbf16>
    %187 = vector.shape_cast %186 : vector<1x128x128xbf16> to vector<128x128xbf16>
    %cst_99 = arith.constant dense<0.000000e+00> : vector<32x128xf32>
    %188 = tpu.matmul %185, %187, %cst_99 {dimension_numbers = #tpu.dot_dimension_numbers<[1], [0], [0], [1], [0, 0, 1, 1], [], []>} : vector<32x128xbf16>, vector<128x128xbf16>, vector<32x128xf32> -> vector<32x128xf32>
    %189 = arith.truncf %188 : vector<32x128xf32> to vector<32x128xbf16>
    %cst_100 = arith.constant dense<0.000000e+00> : vector<32x128xf32>
    %190 = tpu.matmul %0, %189, %cst_100 {dimension_numbers = #tpu.dot_dimension_numbers<[1], [0], [0], [1], [0, 0, 1, 1], [], []>} : vector<32x32xbf16>, vector<32x128xbf16>, vector<32x128xf32> -> vector<32x128xf32>
    %c9_101 = arith.constant 9 : index
    %c0_102 = arith.constant 0 : index
    %191 = vector.load %arg8[%c9_101, %c0_102] : memref<16x128xf32, #tpu.memory_space<vmem>>, vector<1x128xf32>
    %192 = vector.broadcast %191 : vector<1x128xf32> to vector<32x128xf32>
    %193 = arith.addf %190, %192 : vector<32x128xf32>
    %cst_103 = arith.constant 0.000000e+00 : f32
    %194 = vector.broadcast %cst_103 : f32 to vector<32x128xf32>
    %195 = arith.maximumf %193, %194 : vector<32x128xf32>
    %196 = arith.truncf %195 : vector<32x128xf32> to vector<32x128xbf16>
    %c14 = arith.constant 14 : index
    %c0_104 = arith.constant 0 : index
    %c0_105 = arith.constant 0 : index
    %197 = vector.load %arg7[%c14, %c0_104, %c0_105] : memref<16x128x128xbf16, #tpu.memory_space<vmem>>, vector<1x128x128xbf16>
    %198 = vector.shape_cast %197 : vector<1x128x128xbf16> to vector<128x128xbf16>
    %cst_106 = arith.constant dense<0.000000e+00> : vector<32x128xf32>
    %199 = tpu.matmul %196, %198, %cst_106 {dimension_numbers = #tpu.dot_dimension_numbers<[1], [0], [0], [1], [0, 0, 1, 1], [], []>} : vector<32x128xbf16>, vector<128x128xbf16>, vector<32x128xf32> -> vector<32x128xf32>
    %200 = arith.truncf %199 : vector<32x128xf32> to vector<32x128xbf16>
    %cst_107 = arith.constant dense<0.000000e+00> : vector<32x128xf32>
    %201 = tpu.matmul %0, %200, %cst_107 {dimension_numbers = #tpu.dot_dimension_numbers<[1], [0], [0], [1], [0, 0, 1, 1], [], []>} : vector<32x32xbf16>, vector<32x128xbf16>, vector<32x128xf32> -> vector<32x128xf32>
    %c10_108 = arith.constant 10 : index
    %c0_109 = arith.constant 0 : index
    %202 = vector.load %arg8[%c10_108, %c0_109] : memref<16x128xf32, #tpu.memory_space<vmem>>, vector<1x128xf32>
    %203 = vector.broadcast %202 : vector<1x128xf32> to vector<32x128xf32>
    %204 = arith.addf %201, %203 : vector<32x128xf32>
    %205 = arith.truncf %195 : vector<32x128xf32> to vector<32x128xbf16>
    %c15 = arith.constant 15 : index
    %c0_110 = arith.constant 0 : index
    %c0_111 = arith.constant 0 : index
    %206 = vector.load %arg7[%c15, %c0_110, %c0_111] : memref<16x128x128xbf16, #tpu.memory_space<vmem>>, vector<1x128x128xbf16>
    %207 = vector.shape_cast %206 : vector<1x128x128xbf16> to vector<128x128xbf16>
    %cst_112 = arith.constant dense<0.000000e+00> : vector<32x128xf32>
    %208 = tpu.matmul %205, %207, %cst_112 {dimension_numbers = #tpu.dot_dimension_numbers<[1], [0], [0], [1], [0, 0, 1, 1], [], []>} : vector<32x128xbf16>, vector<128x128xbf16>, vector<32x128xf32> -> vector<32x128xf32>
    %209 = arith.truncf %208 : vector<32x128xf32> to vector<32x128xbf16>
    %cst_113 = arith.constant dense<0.000000e+00> : vector<32x128xf32>
    %210 = tpu.matmul %0, %209, %cst_113 {dimension_numbers = #tpu.dot_dimension_numbers<[1], [0], [0], [1], [0, 0, 1, 1], [], []>} : vector<32x32xbf16>, vector<32x128xbf16>, vector<32x128xf32> -> vector<32x128xf32>
    %c11_114 = arith.constant 11 : index
    %c0_115 = arith.constant 0 : index
    %211 = vector.load %arg8[%c11_114, %c0_115] : memref<16x128xf32, #tpu.memory_space<vmem>>, vector<1x128xf32>
    %212 = vector.broadcast %211 : vector<1x128xf32> to vector<32x128xf32>
    %213 = arith.addf %210, %212 : vector<32x128xf32>
    %cst_116 = arith.constant 0.000000e+00 : f32
    %214 = vector.broadcast %cst_116 : f32 to vector<32x128xf32>
    %215 = arith.maximumf %213, %214 : vector<32x128xf32>
    %216 = vector.broadcast %cst_116 : f32 to vector<32x128xf32>
    %217 = arith.subf %213, %216 : vector<32x128xf32>
    %218 = arith.cmpf one, %217, %217 : vector<32x128xf32>
    %219 = vector.broadcast %cst_116 : f32 to vector<32x128xf32>
    %220 = arith.addf %213, %219 : vector<32x128xf32>
    %221 = math.absf %217 : vector<32x128xf32>
    %cst_117 = arith.constant 0.000000e+00 : f32
    %222 = vector.broadcast %cst_117 : f32 to vector<32x128xf32>
    %223 = arith.subf %222, %221 : vector<32x128xf32>
    %224 = math.exp %223 : vector<32x128xf32>
    %225 = math.log1p %224 : vector<32x128xf32>
    %226 = arith.addf %215, %225 : vector<32x128xf32>
    %227 = arith.select %218, %220, %226 : vector<32x128xi1>, vector<32x128xf32>
    %cst_118 = arith.constant 5.000000e-01 : f32
    %228 = vector.broadcast %cst_118 : f32 to vector<32x128xf32>
    %229 = arith.mulf %228, %227 : vector<32x128xf32>
    %230 = math.exp %229 : vector<32x128xf32>
    %231 = arith.mulf %153, %230 : vector<32x128xf32>
    %232 = arith.addf %204, %231 : vector<32x128xf32>
    %c0_119 = arith.constant 0 : index
    %c0_120 = arith.constant 0 : index
    %c0_121 = arith.constant 0 : index
    %233 = vector.load %arg9[%c0_119, %c0_120, %c0_121] : memref<9x32x128xf32, #tpu.memory_space<vmem>>, vector<1x32x128xf32>
    %234 = vector.shape_cast %233 : vector<1x32x128xf32> to vector<32x128xf32>
    %235 = vector.shape_cast %72 : vector<32x128xf32> to vector<1x32x128xf32>
    tpu.vector_store %arg9[%c0_119, %c0_120, %c0_121], %235 {strides = array<i32>} : memref<9x32x128xf32, #tpu.memory_space<vmem>>, vector<1x32x128xf32>,
    %c1_122 = arith.constant 1 : index
    %c0_123 = arith.constant 0 : index
    %c0_124 = arith.constant 0 : index
    %236 = vector.load %arg9[%c1_122, %c0_123, %c0_124] : memref<9x32x128xf32, #tpu.memory_space<vmem>>, vector<1x32x128xf32>
    %237 = vector.shape_cast %236 : vector<1x32x128xf32> to vector<32x128xf32>
    %238 = vector.shape_cast %44 : vector<32x128xf32> to vector<1x32x128xf32>
    tpu.vector_store %arg9[%c1_122, %c0_123, %c0_124], %238 {strides = array<i32>} : memref<9x32x128xf32, #tpu.memory_space<vmem>>, vector<1x32x128xf32>,
    %c2_125 = arith.constant 2 : index
    %c0_126 = arith.constant 0 : index
    %c0_127 = arith.constant 0 : index
    %239 = vector.load %arg9[%c2_125, %c0_126, %c0_127] : memref<9x32x128xf32, #tpu.memory_space<vmem>>, vector<1x32x128xf32>
    %240 = vector.shape_cast %239 : vector<1x32x128xf32> to vector<32x128xf32>
    %241 = vector.shape_cast %67 : vector<32x128xf32> to vector<1x32x128xf32>
    tpu.vector_store %arg9[%c2_125, %c0_126, %c0_127], %241 {strides = array<i32>} : memref<9x32x128xf32, #tpu.memory_space<vmem>>, vector<1x32x128xf32>,
    %c3_128 = arith.constant 3 : index
    %c0_129 = arith.constant 0 : index
    %c0_130 = arith.constant 0 : index
    %242 = vector.load %arg9[%c3_128, %c0_129, %c0_130] : memref<9x32x128xf32, #tpu.memory_space<vmem>>, vector<1x32x128xf32>
    %243 = vector.shape_cast %242 : vector<1x32x128xf32> to vector<32x128xf32>
    %244 = vector.shape_cast %152 : vector<32x128xf32> to vector<1x32x128xf32>
    tpu.vector_store %arg9[%c3_128, %c0_129, %c0_130], %244 {strides = array<i32>} : memref<9x32x128xf32, #tpu.memory_space<vmem>>, vector<1x32x128xf32>,
    %c4_131 = arith.constant 4 : index
    %c0_132 = arith.constant 0 : index
    %c0_133 = arith.constant 0 : index
    %245 = vector.load %arg9[%c4_131, %c0_132, %c0_133] : memref<9x32x128xf32, #tpu.memory_space<vmem>>, vector<1x32x128xf32>
    %246 = vector.shape_cast %245 : vector<1x32x128xf32> to vector<32x128xf32>
    %247 = vector.shape_cast %124 : vector<32x128xf32> to vector<1x32x128xf32>
    tpu.vector_store %arg9[%c4_131, %c0_132, %c0_133], %247 {strides = array<i32>} : memref<9x32x128xf32, #tpu.memory_space<vmem>>, vector<1x32x128xf32>,
    %c5_134 = arith.constant 5 : index
    %c0_135 = arith.constant 0 : index
    %c0_136 = arith.constant 0 : index
    %248 = vector.load %arg9[%c5_134, %c0_135, %c0_136] : memref<9x32x128xf32, #tpu.memory_space<vmem>>, vector<1x32x128xf32>
    %249 = vector.shape_cast %248 : vector<1x32x128xf32> to vector<32x128xf32>
    %250 = vector.shape_cast %147 : vector<32x128xf32> to vector<1x32x128xf32>
    tpu.vector_store %arg9[%c5_134, %c0_135, %c0_136], %250 {strides = array<i32>} : memref<9x32x128xf32, #tpu.memory_space<vmem>>, vector<1x32x128xf32>,
    %c6_137 = arith.constant 6 : index
    %c0_138 = arith.constant 0 : index
    %c0_139 = arith.constant 0 : index
    %251 = vector.load %arg9[%c6_137, %c0_138, %c0_139] : memref<9x32x128xf32, #tpu.memory_space<vmem>>, vector<1x32x128xf32>
    %252 = vector.shape_cast %251 : vector<1x32x128xf32> to vector<32x128xf32>
    %253 = vector.shape_cast %232 : vector<32x128xf32> to vector<1x32x128xf32>
    tpu.vector_store %arg9[%c6_137, %c0_138, %c0_139], %253 {strides = array<i32>} : memref<9x32x128xf32, #tpu.memory_space<vmem>>, vector<1x32x128xf32>,
    %c7_140 = arith.constant 7 : index
    %c0_141 = arith.constant 0 : index
    %c0_142 = arith.constant 0 : index
    %254 = vector.load %arg9[%c7_140, %c0_141, %c0_142] : memref<9x32x128xf32, #tpu.memory_space<vmem>>, vector<1x32x128xf32>
    %255 = vector.shape_cast %254 : vector<1x32x128xf32> to vector<32x128xf32>
    %256 = vector.shape_cast %204 : vector<32x128xf32> to vector<1x32x128xf32>
    tpu.vector_store %arg9[%c7_140, %c0_141, %c0_142], %256 {strides = array<i32>} : memref<9x32x128xf32, #tpu.memory_space<vmem>>, vector<1x32x128xf32>,
    %c8_143 = arith.constant 8 : index
    %c0_144 = arith.constant 0 : index
    %c0_145 = arith.constant 0 : index
    %257 = vector.load %arg9[%c8_143, %c0_144, %c0_145] : memref<9x32x128xf32, #tpu.memory_space<vmem>>, vector<1x32x128xf32>
    %258 = vector.shape_cast %257 : vector<1x32x128xf32> to vector<32x128xf32>
    %259 = vector.shape_cast %227 : vector<32x128xf32> to vector<1x32x128xf32>
    tpu.vector_store %arg9[%c8_143, %c0_144, %c0_145], %259 {strides = array<i32>} : memref<9x32x128xf32, #tpu.memory_space<vmem>>, vector<1x32x128xf32>,
    return
  }
  func.func @transform_0(%arg0: i32) -> (i32, i32) {
    %c0_i32 = arith.constant 0 : i32
    %c0_i32_0 = arith.constant 0 : i32
    %c0_i32_1 = arith.constant 0 : i32
    return %c0_i32, %c0_i32_0 : i32, i32
  }
  func.func @transform_1(%arg0: i32) -> (i32, i32) {
    %c0_i32 = arith.constant 0 : i32
    %c0_i32_0 = arith.constant 0 : i32
    %c0_i32_1 = arith.constant 0 : i32
    return %c0_i32, %c0_i32_0 : i32, i32
  }
  func.func @transform_2(%arg0: i32) -> (i32, i32) {
    %c0_i32 = arith.constant 0 : i32
    %c0_i32_0 = arith.constant 0 : i32
    %c0_i32_1 = arith.constant 0 : i32
    return %c0_i32, %c0_i32_0 : i32, i32
  }
  func.func @transform_3(%arg0: i32) -> (i32, i32) {
    %c0_i32 = arith.constant 0 : i32
    %c0_i32_0 = arith.constant 0 : i32
    %c0_i32_1 = arith.constant 0 : i32
    return %c0_i32, %c0_i32_0 : i32, i32
  }
  func.func @transform_4(%arg0: i32) -> (i32, i32) {
    %c0_i32 = arith.constant 0 : i32
    %c0_i32_0 = arith.constant 0 : i32
    %c0_i32_1 = arith.constant 0 : i32
    return %c0_i32, %c0_i32_0 : i32, i32
  }
  func.func @transform_5(%arg0: i32) -> (i32, i32) {
    %c0_i32 = arith.constant 0 : i32
    %c0_i32_0 = arith.constant 0 : i32
    %c0_i32_1 = arith.constant 0 : i32
    return %c0_i32, %c0_i32_0 : i32, i32
  }
  func.func @transform_6(%arg0: i32) -> (i32, i32, i32) {
    %c0_i32 = arith.constant 0 : i32
    %c0_i32_0 = arith.constant 0 : i32
    %c0_i32_1 = arith.constant 0 : i32
    %c0_i32_2 = arith.constant 0 : i32
    return %c0_i32, %c0_i32_0, %c0_i32_1 : i32, i32, i32
  }
  func.func @transform_7(%arg0: i32) -> (i32, i32) {
    %c0_i32 = arith.constant 0 : i32
    %c0_i32_0 = arith.constant 0 : i32
    %c0_i32_1 = arith.constant 0 : i32
    return %c0_i32, %c0_i32_0 : i32, i32
  }
  func.func @transform_8(%arg0: i32) -> (i32, i32, i32) {
    %c0_i32 = arith.constant 0 : i32
    %c0_i32_0 = arith.constant 0 : i32
    %c0_i32_1 = arith.constant 0 : i32
    %c0_i32_2 = arith.constant 0 : i32
    return %c0_i32, %c0_i32_0, %c0_i32_1 : i32, i32, i32
  }
}

module attributes {stable_mosaic.version = 11 : i64} {
  func.func @_decoder_kernel(%arg0: i32, %arg1: memref<24x128xf32, #tpu.memory_space<vmem>>, %arg2: memref<24x128xf32, #tpu.memory_space<vmem>>, %arg3: memref<1x128xf32, #tpu.memory_space<vmem>>) attributes {dimension_semantics = [#tpu.dimension_semantics<arbitrary>], iteration_bounds = array<i64: 1>, scalar_prefetch = 0 : i64, scratch_operands = 0 : i64, tpu.core_type = #tpu.core_type<tc>, window_params = [{pipeline_mode = #tpu.pipeline_mode<synchronous>, transform_indices = @transform_0, window_bounds = array<i64: 24, 128>}, {pipeline_mode = #tpu.pipeline_mode<synchronous>, transform_indices = @transform_1, window_bounds = array<i64: 24, 128>}, {pipeline_mode = #tpu.pipeline_mode<synchronous>, transform_indices = @transform_2, window_bounds = array<i64: 1, 128>}]} {
    %c0 = arith.constant 0 : index
    %c0_0 = arith.constant 0 : index
    %0 = vector.load %arg1[%c0, %c0_0] : memref<24x128xf32, #tpu.memory_space<vmem>>, vector<24x128xf32>
    %c0_1 = arith.constant 0 : index
    %c0_2 = arith.constant 0 : index
    %1 = vector.load %arg2[%c0_1, %c0_2] : memref<24x128xf32, #tpu.memory_space<vmem>>, vector<24x128xf32>
    %2 = arith.mulf %0, %1 : vector<24x128xf32>
    %cst = arith.constant dense<0.000000e+00> : vector<128xf32>
    %3 = vector.multi_reduction <add>, %2, %cst [0] : vector<24x128xf32> to vector<128xf32>
    %4 = vector.shape_cast %3 : vector<128xf32> to vector<1x128xf32>
    %5 = arith.negf %4 : vector<1x128xf32>
    %6 = math.exp %5 : vector<1x128xf32>
    %cst_3 = arith.constant 1.000000e+00 : f32
    %7 = vector.broadcast %cst_3 : f32 to vector<1x128xf32>
    %8 = arith.addf %7, %6 : vector<1x128xf32>
    %9 = arith.divf %7, %8 : vector<1x128xf32>
    %c0_4 = arith.constant 0 : index
    %c0_5 = arith.constant 0 : index
    %10 = vector.load %arg3[%c0_4, %c0_5] : memref<1x128xf32, #tpu.memory_space<vmem>>, vector<1x128xf32>
    tpu.vector_store %arg3[%c0_4, %c0_5], %9 {strides = array<i32>} : memref<1x128xf32, #tpu.memory_space<vmem>>, vector<1x128xf32>,
    return
  }
  func.func @transform_0(%arg0: i32) -> (i32, i32) {
    %c0_i32 = arith.constant 0 : i32
    %c0_i32_0 = arith.constant 0 : i32
    %c0_i32_1 = arith.constant 0 : i32
    return %c0_i32, %c0_i32_0 : i32, i32
  }
  func.func @transform_1(%arg0: i32) -> (i32, i32) {
    %c0_i32 = arith.constant 0 : i32
    %c0_i32_0 = arith.constant 0 : i32
    %c0_i32_1 = arith.constant 0 : i32
    return %c0_i32, %c0_i32_0 : i32, i32
  }
  func.func @transform_2(%arg0: i32) -> (i32, i32) {
    %c0_i32 = arith.constant 0 : i32
    %c0_i32_0 = arith.constant 0 : i32
    %c0_i32_1 = arith.constant 0 : i32
    return %c0_i32, %c0_i32_0 : i32, i32
  }
}

</mosaic_0001>

<bundles_post_ra>
// kernel: _lambda_.3
= control target key start
LH: loop header
LB: loop body
LE: loop exit
PB: predicated region body
PF: predicated region fallthrough
CT: control target
= control target key end

     0   :  { %s80_s0 = inlined_call_operand.vmem [shape: f32[24,128], index: 0, kind: input, shape index: {}]   ;;  %s81_s1 = inlined_call_operand.vmem [shape: f32[24,128], index: 1, kind: input, shape index: {}]   ;;  %s82_s2 = inlined_call_operand.vmem [shape: f32[1,128], index: 2, kind: output, shape index: {}]  }
   0x1   :  { %v11_v0 = vld [vmem:[%s80_s0] sm:$0xff]  ;;  %v12_v1 = vld [vmem:[%s80_s0 + $0x8] sm:$0xff]  ;;  %v13_v2 = vld [vmem:[%s80_s0 + $0x10] sm:$0xff] }
   0x2   :  { %v14_v3 = vld [vmem:[%s81_s1] sm:$0xff]  ;;  %v15_v4 = vld [vmem:[%s81_s1 + $0x8] sm:$0xff]  ;;  %v16_v5 = vld [vmem:[%s81_s1 + $0x10] sm:$0xff] }
   0x3   :  { %v17_v6 = vmul.f32 %v14_v3, %v11_v0  ;;  %v18_v7 = vmul.f32 %v15_v4, %v12_v1  ;;  %v19_v8 = vmul.f32 %v16_v5, %v13_v2 }
   0x5   :  { %v20_v9 = vadd.f32 %v18_v7, %v17_v6 }
   0x7   :  { %v21_v10 = vadd.f32 %v20_v9, %v19_v8 }
   0x9   :  { %v22_v11 = vrot.slane %v21_v10, 4 }
   0xb   :  { %v23_v12 = vadd.f32 %v22_v11, %v21_v10 }
   0xd   :  { %v24_v13 = vrot.slane %v23_v12, 2 }
   0xf   :  { %v25_v14 = vadd.f32 %v24_v13, %v23_v12 }
  0x11   :  { %v26_v15 = vrot.slane %v25_v14, 1 }
  0x13   :  { %v27_v16 = vadd.f32 %v26_v15, %v25_v14 }
  0x15   :  { %v39_v17 = vmul.f32 -1.442695, %v27_v16 }
  0x17   :  { %40 = vpow2.f32 %v39_v17 }
  0x21   :  { %v41_v18 = vpop.eup %40 }
  0x22   :  { %v31_v19 = vadd.f32 1.0, %v41_v18 }
  0x24   :  { %42 = vrcp.f32 %v31_v19 }
  0x2e   :  { %v43_v20 = vpop.eup %42 }
  0x2f   :  { %34 = vst [vmem:[%s82_s2] sm:$0x1] %v43_v20 }

// kernel: _lambda_.2
= control target key start
LH: loop header
LB: loop body
LE: loop exit
PB: predicated region body
PF: predicated region fallthrough
CT: control target
= control target key end

     0   :  { %13 = vsyncpa [#allocation3], 0  ;;  %s4829_s0 = inlined_call_operand.hbm [shape: bf16[32,32], index: 0, kind: input, shape index: {}]   ;;  %s4830_s1 = inlined_call_operand.hbm [shape: f32[32,128], index: 1, kind: input, shape index: {}]   ;;  %s4831_s2 = inlined_call_operand.hbm [shape: f32[32,128], index: 2, kind: input, shape index: {}]   ;;  %s4832_s3 = inlined_call_operand.hbm [shape: f32[32,128], index: 3, kind: input, shape index: {}]   ;;  %s4833_s4 = inlined_call_operand.hbm [shape: f32[32,128], index: 4, kind: input, shape index: {}]   ;;  %s4834_s5 = inlined_call_operand.hbm [shape: f32[32,128], index: 5, kind: input, shape index: {}]   ;;  %s4835_s6 = inlined_call_operand.hbm [shape: bf16[16,128,128], index: 6, kind: input, shape index: {}]   ;;  %s4836_s7 = inlined_call_operand.hbm [shape: f32[16,128], index: 7, kind: input, shape index: {}]   ;;  %s4837_s8 = inlined_call_operand.hbm [shape: f32[9,32,128], index: 8, kind: output, shape index: {}]  }
   0x1   :  { %14 = vsyncpa [#allocation6], 0 }
   0x2   :  { %15 = vsyncpa [#allocation9], 0 }
   0x3   :  { %16 = vsyncpa [#allocation12], 0 }
   0x4   :  { %17 = vsyncpa [#allocation15], 0 }
   0x5   :  { %18 = vsyncpa [#allocation4], 0  ;;  %s4398_s27 = smov [#allocation5]   ;;  %s4188_s9 = scalar_lea.hbm %s4830_s1, 512 }
   0x6   :  { %s36_s28 = sshll.u32 %s4398_s27, 4  ;;  %p4189_p0 = scmp.ne.s32.totalorder %s4830_s1, %s4188_s9  ;;  %s37_s28 = int_to_ptr.vmem [resolvable:$true] %s36_s28 }
   0x7   :  { %p4192_p1 = scmp.lt.u32.totalorder %s4188_s9, %s4830_s1 }
   0x9   :  { %p4194_p2 = pnand %p4192_p1, %p4189_p0 }
   0xb   :  { %4197 = shalt.err (!%p4194_p2)
}
   0xc   :  { %s4198_s14 = scalar_lea.vmem %s37_s28, 512  ;;  %p4203_p4 = scmp.lt.s32.totalorder %s37_s28, %s37_s28 }
   0xd   :  { %p4199_p3 = scmp.ne.s32.totalorder %s37_s28, %s4198_s14  ;;  %p4204_p5 = scmp.lt.s32.totalorder %s4198_s14, %s4198_s14 }
   0xf   :  { %p4205_p6 = por %p4204_p5, %p4203_p4 }
  0x11   :  { %p4206_p7 = pnand %p4205_p6, %p4199_p3 }
  0x13   :  { %4209 = shalt.err (!%p4206_p7)
}
  0x14   :  { %s4399_s15 = smov 128   ;;  %s4400_s16 = smov 8  }
  0x15   :  { %42 = dma.hbm_to_vmem [thread:$0]  %s4830_s1, 512, %s37_s28, [#allocation6], %s4399_s15, %s4399_s15, %s4400_s16  }
  0x16   :  { %s4401_s19 = smov [#allocation8]   ;;  %s4402_s21 = smov [#allocation11]  }
  0x17   :  { %s60_s20 = sshll.u32 %s4401_s19, 4  ;;  %s84_s22 = sshll.u32 %s4402_s21, 4  ;;  %s61_s20 = int_to_ptr.vmem [resolvable:$true] %s60_s20  ;;  %s85_s22 = int_to_ptr.vmem [resolvable:$true] %s84_s22 }
  0x18   :  { %s4210_s25 = scalar_lea.hbm %s4832_s3, 512 }
  0x19   :  { %p4211_p8 = scmp.ne.s32.totalorder %s4832_s3, %s4210_s25  ;;  %p4214_p9 = scmp.lt.u32.totalorder %s4210_s25, %s4832_s3 }
  0x1b   :  { %p4216_p10 = pnand %p4214_p9, %p4211_p8 }
  0x1d   :  { %4219 = shalt.err (!%p4216_p10)
}
  0x1e   :  { %s4220_s1 = scalar_lea.vmem %s61_s20, 512  ;;  %p4225_p12 = scmp.lt.s32.totalorder %s61_s20, %s61_s20 }
  0x1f   :  { %p4221_p11 = scmp.ne.s32.totalorder %s61_s20, %s4220_s1  ;;  %p4226_p13 = scmp.lt.s32.totalorder %s4220_s1, %s4220_s1 }
  0x21   :  { %p4227_p0 = por %p4226_p13, %p4225_p12 }
  0x23   :  { %p4228_p1 = pnand %p4227_p0, %p4221_p11 }
  0x25   :  { %4231 = shalt.err (!%p4228_p1)
}
  0x26   :  { %66 = dma.hbm_to_vmem [thread:$0]  %s4832_s3, 512, %s61_s20, [#allocation9], %s4399_s15, %s4399_s15, %s4400_s16  }
  0x27   :  { %s4232_s12 = scalar_lea.hbm %s4834_s5, 512 }
  0x28   :  { %p4233_p2 = scmp.ne.s32.totalorder %s4834_s5, %s4232_s12  ;;  %p4236_p3 = scmp.lt.u32.totalorder %s4232_s12, %s4834_s5 }
  0x2a   :  { %p4238_p4 = pnand %p4236_p3, %p4233_p2 }
  0x2c   :  { %4241 = shalt.err (!%p4238_p4)
}
  0x2d   :  { %s4242_s19 = scalar_lea.vmem %s85_s22, 512  ;;  %p4247_p6 = scmp.lt.s32.totalorder %s85_s22, %s85_s22 }
  0x2e   :  { %p4243_p5 = scmp.ne.s32.totalorder %s85_s22, %s4242_s19  ;;  %p4248_p7 = scmp.lt.s32.totalorder %s4242_s19, %s4242_s19 }
  0x30   :  { %p4249_p8 = por %p4248_p7, %p4247_p6 }
  0x32   :  { %p4250_p9 = pnand %p4249_p8, %p4243_p5 }
  0x34   :  { %4253 = shalt.err (!%p4250_p9)
}
  0x35   :  { %90 = dma.hbm_to_vmem [thread:$0]  %s4834_s5, 512, %s85_s22, [#allocation12], %s4399_s15, %s4399_s15, %s4400_s16  }
  0x36   :  { %s4403_s21 = smov [#allocation2]   ;;  %s4254_s26 = scalar_lea.hbm %s4829_s0, 256 }
  0x37   :  { %s24_s23 = sshll.u32 %s4403_s21, 4  ;;  %p4255_p10 = scmp.ne.s32.totalorder %s4829_s0, %s4254_s26  ;;  %s25_s23 = int_to_ptr.vmem [resolvable:$true] %s24_s23 }
  0x38   :  { %p4258_p11 = scmp.lt.u32.totalorder %s4254_s26, %s4829_s0 }
  0x3a   :  { %p4260_p12 = pnand %p4258_p11, %p4255_p10 }
  0x3c   :  { %4263 = shalt.err (!%p4260_p12)
}
  0x3d   :  { %s4264_s28 = scalar_lea.vmem %s25_s23, 256  ;;  %p4269_p0 = scmp.lt.s32.totalorder %s25_s23, %s25_s23 }
  0x3e   :  { %p4265_p13 = scmp.ne.s32.totalorder %s25_s23, %s4264_s28  ;;  %p4270_p1 = scmp.lt.s32.totalorder %s4264_s28, %s4264_s28 }
  0x40   :  { %p4271_p2 = por %p4270_p1, %p4269_p0 }
  0x42   :  { %p4272_p3 = pnand %p4271_p2, %p4265_p13 }
  0x44   :  { %4275 = shalt.err (!%p4272_p3)
}
  0x45   :  { %s4404_s5 = smov 64   ;;  %s4405_s22 = smov 4  }
  0x46   :  { %30 = dma.hbm_to_vmem [thread:$0]  %s4829_s0, 256, %s25_s23, [#allocation3], %s4404_s5, %s4404_s5, %s4405_s22  }
  0x47   :  { %s4406_s11 = smov [#allocation7]   ;;  %s4407_s13 = smov [#allocation10]  }
  0x48   :  { %s48_s12 = sshll.u32 %s4406_s11, 4  ;;  %s72_s14 = sshll.u32 %s4407_s13, 4  ;;  %s49_s12 = int_to_ptr.vmem [resolvable:$true] %s48_s12  ;;  %s4516_s14 = int_to_ptr.vmem [resolvable:$true] %s72_s14 }
  0x49   :  { %s4276_s19 = scalar_lea.hbm %s4831_s2, 512 }
  0x4a   :  { %p4277_p4 = scmp.ne.s32.totalorder %s4831_s2, %s4276_s19  ;;  %p4280_p5 = scmp.lt.u32.totalorder %s4276_s19, %s4831_s2 }
  0x4c   :  { %p4282_p6 = pnand %p4280_p5, %p4277_p4 }
  0x4e   :  { %4285 = shalt.err (!%p4282_p6)
}
  0x4f   :  { %s4286_s0 = scalar_lea.vmem %s49_s12, 512  ;;  %p4291_p8 = scmp.lt.s32.totalorder %s49_s12, %s49_s12 }
  0x50   :  { %p4287_p7 = scmp.ne.s32.totalorder %s49_s12, %s4286_s0  ;;  %p4292_p9 = scmp.lt.s32.totalorder %s4286_s0, %s4286_s0 }
  0x52   :  { %p4293_p10 = por %p4292_p9, %p4291_p8 }
  0x54   :  { %p4294_p11 = pnand %p4293_p10, %p4287_p7 }
  0x56   :  { %4297 = shalt.err (!%p4294_p11)
}
  0x57   :  { %54 = dma.hbm_to_vmem [thread:$0]  %s4831_s2, 512, %s49_s12, [#allocation6], %s4399_s15, %s4399_s15, %s4400_s16  }
  0x58   :  { %s4298_s29 = scalar_lea.hbm %s4833_s4, 512 }
  0x59   :  { %p4299_p12 = scmp.ne.s32.totalorder %s4833_s4, %s4298_s29  ;;  %p4302_p13 = scmp.lt.u32.totalorder %s4298_s29, %s4833_s4 }
  0x5b   :  { %p4304_p0 = pnand %p4302_p13, %p4299_p12 }
  0x5d   :  { %4307 = shalt.err (!%p4304_p0)
}
  0x5e   :  { %s4308_s10 = scalar_lea.vmem %s4516_s14, 512  ;;  %p4313_p2 = scmp.lt.s32.totalorder %s4516_s14, %s4516_s14 }
  0x5f   :  { %p4309_p1 = scmp.ne.s32.totalorder %s4516_s14, %s4308_s10  ;;  %p4314_p3 = scmp.lt.s32.totalorder %s4308_s10, %s4308_s10 }
  0x61   :  { %p4315_p4 = por %p4314_p3, %p4313_p2 }
  0x63   :  { %p4316_p5 = pnand %p4315_p4, %p4309_p1 }
  0x65   :  { %4319 = shalt.err (!%p4316_p5)
}
  0x66   :  { %78 = dma.hbm_to_vmem [thread:$0]  %s4833_s4, 512, %s4516_s14, [#allocation9], %s4399_s15, %s4399_s15, %s4400_s16  }
  0x67   :  { %s4408_s12 = smov [#allocation13]   ;;  %s4409_s17 = smov [#allocation14]  }
  0x68   :  { %s96_s13 = sshll.u32 %s4408_s12, 4  ;;  %s108_s18 = sshll.u32 %s4409_s17, 4  ;;  %s97_s13 = int_to_ptr.vmem [resolvable:$true] %s96_s13  ;;  %s4553_s18 = int_to_ptr.vmem [resolvable:$true] %s108_s18 }
  0x69   :  { %s4320_s20 = scalar_lea.hbm %s4835_s6, 16384 }
  0x6a   :  { %p4321_p6 = scmp.ne.s32.totalorder %s4835_s6, %s4320_s20  ;;  %p4324_p7 = scmp.lt.u32.totalorder %s4320_s20, %s4835_s6 }
  0x6c   :  { %p4326_p8 = pnand %p4324_p7, %p4321_p6 }
  0x6e   :  { %4329 = shalt.err (!%p4326_p8)
}
  0x6f   :  { %s4330_s4 = scalar_lea.vmem %s97_s13, 16384  ;;  %p4335_p10 = scmp.lt.s32.totalorder %s97_s13, %s97_s13 }
  0x70   :  { %p4331_p9 = scmp.ne.s32.totalorder %s97_s13, %s4330_s4  ;;  %p4336_p11 = scmp.lt.s32.totalorder %s4330_s4, %s4330_s4 }
  0x72   :  { %p4337_p12 = por %p4336_p11, %p4335_p10 }
  0x74   :  { %p4338_p13 = pnand %p4337_p12, %p4331_p9 }
  0x76   :  { %4341 = shalt.err (!%p4338_p13)
}
  0x77   :  { %102 = dma.hbm_to_vmem [thread:$0]  %s4835_s6, 16384, %s97_s13, [#allocation12], %s4404_s5, %s4404_s5, %s4405_s22  }
  0x78   :  { %s4342_s29 = scalar_lea.hbm %s4836_s7, 256 }
  0x79   :  { %p4343_p0 = scmp.ne.s32.totalorder %s4836_s7, %s4342_s29  ;;  %p4346_p1 = scmp.lt.u32.totalorder %s4342_s29, %s4836_s7 }
  0x7b   :  { %p4348_p2 = pnand %p4346_p1, %p4343_p0 }
  0x7d   :  { %4351 = shalt.err (!%p4348_p2)
}
  0x7e   :  { %s4352_s10 = scalar_lea.vmem %s4553_s18, 256  ;;  %p4357_p4 = scmp.lt.s32.totalorder %s4553_s18, %s4553_s18 }
  0x7f   :  { %p4353_p3 = scmp.ne.s32.totalorder %s4553_s18, %s4352_s10  ;;  %p4358_p5 = scmp.lt.s32.totalorder %s4352_s10, %s4352_s10 }
  0x81   :  { %p4359_p6 = por %p4358_p5, %p4357_p4 }
  0x83   :  { %p4360_p7 = pnand %p4359_p6, %p4353_p3 }
  0x85   :  { %4363 = shalt.err (!%p4360_p7)
}
  0x86   :  { %114 = dma.hbm_to_vmem [thread:$0]  %s4836_s7, 256, %s4553_s18, [#allocation15], %s4399_s15, %s4399_s15, %s4400_s16  }
  0x87   :  { %4386 = dma.done.wait [#allocation3], 256  }
  0x88   :  { %4387 = vsyncadd [#allocation3], 4294967040 }
  0x89   :  { %4388 = dma.done.wait [#allocation6], 1024  }
  0x8a   :  { %4389 = vsyncadd [#allocation6], 4294966272 }
  0x8b   :  { %4390 = dma.done.wait [#allocation9], 1024  }
  0x8c   :  { %4391 = vsyncadd [#allocation9], 4294966272 }
  0x8d   :  { %4392 = dma.done.wait [#allocation12], 16896  }
  0x8e   :  { %4393 = vsyncadd [#allocation12], 4294950400 }
  0x8f   :  { %4394 = dma.done.wait [#allocation15], 256  }
  0x90   :  { %4395 = vsyncadd [#allocation15], 4294967040  ;;  %v3960_v0 = vld [vmem:[#allocation13] sm:$0xff]   ;;  %v3961_v1 = vld [vmem:[#allocation13 + $0x8] sm:$0xff]   ;;  %vm288_vm0 = vcmask 261120   ;;  %s4410_s7 = smov [#allocation16]  }
  0x91   :  { %3515 = vmatprep.subr.bf16.mxu0 %v3960_v0  ;;  %v3962_v2 = vld [vmem:[#allocation13 + $0x10] sm:$0xff]   ;;  %v3963_v3 = vld [vmem:[#allocation13 + $0x18] sm:$0xff]   ;;  %v144_v4 = vld [vmem:[#allocation5] sm:$0xff]  ;;  %s3125_s22 = sshll.u32 %s4410_s7, 4  ;;  %s3126_s22 = int_to_ptr.vmem [resolvable:$true] %s3125_s22 }
  0x92   :  { %3516 = vmatpush3.bf16.msra.mxu0 %v3960_v0  ;;  %v145_v5 = vld [vmem:[#allocation5 + $0x8] sm:$0xff]  ;;  %v3964_v7 = vld [vmem:[#allocation13 + $0x20] sm:$0xff]   ;;  %v3966_v9 = vld [vmem:[#allocation13 + $0x30] sm:$0xff]   ;;  %s4364_s2 = scalar_lea.vmem %s3126_s22, 4608  ;;  %p4369_p9 = scmp.lt.s32.totalorder %s3126_s22, %s3126_s22 }
  0x93   :  { %3517 = vmatprep.subr.bf16.mxu0 %v3961_v1  ;;  %v4590_v6 = vpack.c.bf16 %v145_v5, %v144_v4  ;;  %v3965_v8 = vld [vmem:[#allocation13 + $0x28] sm:$0xff]   ;;  %v3967_v10 = vld [vmem:[#allocation13 + $0x38] sm:$0xff]   ;;  %v146_v11 = vld [vmem:[#allocation5 + $0x10] sm:$0xff]  ;;  %p4365_p8 = scmp.ne.s32.totalorder %s3126_s22, %s4364_s2  ;;  %p4370_p10 = scmp.lt.s32.totalorder %s4364_s2, %s4364_s2 }
  0x94   :  { %v147_v12 = vld [vmem:[#allocation5 + $0x18] sm:$0xff]  ;;  %v4596_v14 = vld [vmem:[#allocation2] sm:$0xff]   ;;  %v3970_v22 = vld [vmem:[#allocation13 + $0x40] sm:$0xff]  }
  0x95   :  { %3531 = vmatprep.mubr.bf16.mxu0 %v4590_v6  ;;  %v4593_v13 = vpack.c.bf16 %v147_v12, %v146_v11  ;;  %v4600_v21 = vld [vmem:[#allocation2 + $0x8] sm:$0xff]   ;;  %v3971_v23 = vld [vmem:[#allocation13 + $0x48] sm:$0xff]   ;;  %3543 = vmatprep.subr.bf16.mxu1 %v3970_v22  ;;  %v3972_v24 = vld [vmem:[#allocation13 + $0x50] sm:$0xff]   ;;  %p4371_p11 = por %p4370_p10, %p4369_p9 }
  0x96   :  { %3518 = vmatpush3.bf16.msra.mxu0 %v3961_v1  ;;  %3544 = vmatpush3.bf16.msra.mxu1 %v3970_v22  ;;  %v3149_v25 = vld [vmem:[#allocation14] ss:$0 sm:$0xff]  ;;  %v3973_v42 = vld [vmem:[#allocation13 + $0x58] sm:$0xff]   ;;  %v3975_v44 = vld [vmem:[#allocation13 + $0x68] sm:$0xff]  }
  0x97   :  { %3519 = vmatprep.subr.bf16.mxu0 %v3962_v2  ;;  %3545 = vmatprep.subr.bf16.mxu1 %v3971_v23  ;;  %v3974_v43 = vld [vmem:[#allocation13 + $0x60] sm:$0xff]   ;;  %v3976_v45 = vld [vmem:[#allocation13 + $0x70] sm:$0xff]   ;;  %v3977_v46 = vld [vmem:[#allocation13 + $0x78] sm:$0xff]   ;;  %p4372_p12 = pnand %p4371_p11, %p4365_p8 }
  0x98   :  { %v3981_v11 = vld [vmem:[#allocation13 + $0x98] sm:$0xff]   ;;  %v3982_v12 = vld [vmem:[#allocation13 + $0xa0] sm:$0xff]  }
  0x9a   :  { %3520 = vmatpush3.bf16.msra.mxu0 %v3962_v2  ;;  %3546 = vmatpush3.bf16.msra.mxu1 %v3971_v23 }
  0x9b   :  { %3521 = vmatprep.subr.bf16.mxu0 %v3963_v3  ;;  %3547 = vmatprep.subr.bf16.mxu1 %v3972_v24 }
  0x9e   :  { %3522 = vmatpush3.bf16.msra.mxu0 %v3963_v3  ;;  %3548 = vmatpush3.bf16.msra.mxu1 %v3972_v24 }
  0x9f   :  { %3523 = vmatprep.subr.bf16.mxu0 %v3964_v7  ;;  %3549 = vmatprep.subr.bf16.mxu1 %v3973_v42 }
  0xa2   :  { %3524 = vmatpush3.bf16.msra.mxu0 %v3964_v7  ;;  %3550 = vmatpush3.bf16.msra.mxu1 %v3973_v42  ;;  %v3988_v42 = vld [vmem:[#allocation13 + $0xd0] sm:$0xff]  }
  0xa3   :  { %3525 = vmatprep.subr.bf16.mxu0 %v3965_v8  ;;  %3551 = vmatprep.subr.bf16.mxu1 %v3974_v43 }
  0xa6   :  { %3526 = vmatpush3.bf16.msra.mxu0 %v3965_v8  ;;  %3552 = vmatpush3.bf16.msra.mxu1 %v3974_v43  ;;  %v3978_v8 = vld [vmem:[#allocation13 + $0x80] sm:$0xff]   ;;  %v3989_v43 = vld [vmem:[#allocation13 + $0xd8] sm:$0xff]  }
  0xa7   :  { %3527 = vmatprep.subr.bf16.mxu0 %v3966_v9  ;;  %3553 = vmatprep.subr.bf16.mxu1 %v3975_v44 }
  0xaa   :  { %3528 = vmatpush3.bf16.msra.mxu0 %v3966_v9  ;;  %3554 = vmatpush3.bf16.msra.mxu1 %v3975_v44  ;;  %v3979_v9 = vld [vmem:[#allocation13 + $0x88] sm:$0xff]   ;;  %v3990_v44 = vld [vmem:[#allocation13 + $0xe0] sm:$0xff]  }
  0xab   :  { %3529 = vmatprep.subr.bf16.mxu0 %v3967_v10  ;;  %3555 = vmatprep.subr.bf16.mxu1 %v3976_v45 }
  0xae   :  { %3530 = vmatpush3.bf16.msra.mxu0 %v3967_v10  ;;  %3556 = vmatpush3.bf16.msra.mxu1 %v3976_v45  ;;  %v3980_v10 = vld [vmem:[#allocation13 + $0x90] sm:$0xff]   ;;  %v3991_v45 = vld [vmem:[#allocation13 + $0xe8] sm:$0xff]  }
  0xaf   :  { %3557 = vmatprep.subr.bf16.mxu1 %v3977_v46 }
  0xb1   :  { %3532 = vmatmul.mubr.bf16.vlgmr.msra.gmra.mrb[0].mxu0 %v4593_v13 }
  0xb2   :  { %3539 = vmatprep.mubr.msk.bf16.mxu0 %vm288_vm0, %v4596_v14  ;;  %3558 = vmatpush3.bf16.msra.mxu1 %v3977_v46  ;;  %v3992_v46 = vld [vmem:[#allocation13 + $0xf0] sm:$0xff]  }
 0x184   :  { %v3533_v15 = vpop.f32.mrb[0].mxu0 }
 0x185   :  { %v256_v16 = vpop.f32.mrb[1].mxu0 }
 0x186   :  { %v3534_v17 = vpop.f32.mrb[2].mxu0 }
 0x187   :  { %v272_v18 = vpack.c.bf16 %v3534_v17, %v3533_v15  ;;  %v259_v19 = vpop.f32.mrb[3].mxu0  ;;  %v3983_v15 = vld [vmem:[#allocation13 + $0xa8] sm:$0xff]   ;;  %v3985_v17 = vld [vmem:[#allocation13 + $0xb8] sm:$0xff]  }
 0x188   :  { %v271_v20 = vpack.c.bf16 %v259_v19, %v256_v16  ;;  %v3984_v16 = vld [vmem:[#allocation13 + $0xb0] sm:$0xff]  }
 0x18a   :  { %3535 = vmatprep.subr.bf16.mxu0 %v271_v20 }
 0x18b   :  { %3536 = vmatpush3.bf16.msra.mxu0 %v271_v20 }
 0x18c   :  { %3537 = vmatprep.subr.bf16.mxu0 %v272_v18 }
 0x18f   :  { %3538 = vmatpush3.bf16.msra.mxu0 %v272_v18  ;;  %v3162_v18 = vld [vmem:[#allocation14 + $0x1] ss:$0 sm:$0xff] }
 0x192   :  { %3540 = vmatmul.mubr.msk.bf16.vlgmr.msra.gmra.mrb[4].mxu0 %vm288_vm0, %v4600_v21 }
 0x193   :  { %3567 = vmatprep.mubr.msk.bf16.mxu0 %vm288_vm0, %v4596_v14 }
 0x265   :  { %v3541_v26 = vpop.f32.mrb[4].mxu0 }
 0x266   :  { %v338_v27 = vadd.f32 %v3541_v26, %v3149_v25  ;;  %v329_v28 = vpop.f32.mrb[5].mxu0 }
 0x267   :  { %v330_v29 = vadd.f32 %v3149_v25, %v329_v28  ;;  %v3542_v30 = vpop.f32.mrb[6].mxu0 }
 0x268   :  { %v346_v31 = vmax.f32 %v338_v27, 0.0  ;;  %v341_v32 = vadd.f32 %v3542_v30, %v3149_v25  ;;  %v332_v33 = vpop.f32.mrb[7].mxu0 }
 0x269   :  { %v344_v34 = vmax.f32 %v330_v29, 0.0  ;;  %v333_v35 = vadd.f32 %v3149_v25, %v332_v33 }
 0x26a   :  { %v347_v36 = vmax.f32 %v341_v32, 0.0  ;;  %v350_v37 = vmul.f32 %v346_v31, %v346_v31 }
 0x26b   :  { %v345_v38 = vmax.f32 %v333_v35, 0.0  ;;  %v348_v39 = vmul.f32 %v344_v34, %v344_v34 }
 0x26c   :  { %356 = vadd.xlane.f32.xlu1 %v350_v37  ;;  %v351_v40 = vmul.f32 %v347_v36, %v347_v36 }
 0x26d   :  { %352 = vadd.xlane.f32.xlu0 %v348_v39  ;;  %v349_v41 = vmul.f32 %v345_v38, %v345_v38 }
 0x270   :  { %358 = vadd.xlane.f32.xlu1 %v351_v40  ;;  %v3986_v40 = vld [vmem:[#allocation13 + $0xc0] sm:$0xff]  }
 0x271   :  { %354 = vadd.xlane.f32.xlu0 %v349_v41  ;;  %v3987_v41 = vld [vmem:[#allocation13 + $0xc8] sm:$0xff]  }
 0x2f9   :  { %v357_v47 = vpop.xlane.xlu1 %356 }
 0x2fa   :  { %v362_v48 = vmax.f32 %v357_v47, 1e-24  ;;  %v353_v49 = vpop.xlane.xlu0 %352  ;;  %v3993_v47 = vld [vmem:[#allocation13 + $0xf8] sm:$0xff]  }
 0x2fb   :  { %v360_v50 = vmax.f32 %v353_v49, 1e-24 }
 0x2fc   :  { %4090 = vrsqrt.f32 %v362_v48  ;;  %v3173_v48 = vld [vmem:[#allocation14 + $0x2] ss:$0 sm:$0xff] }
 0x2fd   :  { %v359_v51 = vpop.xlane.xlu1 %358  ;;  %4092 = vrsqrt.f32 %v360_v50 }
 0x2fe   :  { %v363_v52 = vmax.f32 %v359_v51, 1e-24  ;;  %v355_v53 = vpop.xlane.xlu0 %354 }
 0x2ff   :  { %v361_v54 = vmax.f32 %v355_v53, 1e-24 }
 0x300   :  { %4094 = vrsqrt.f32 %v363_v52 }
 0x301   :  { %4096 = vrsqrt.f32 %v361_v54 }
 0x306   :  { %v4091_v55 = vpop.eup %4090 }
 0x307   :  { %v4093_v56 = vpop.eup %4092  ;;  %v370_v62 = vmul.f32 %v4091_v55, %v346_v31 }
 0x308   :  { %v368_v60 = vmul.f32 %v4093_v56, %v344_v34 }
 0x30a   :  { %v4095_v57 = vpop.eup %4094 }
 0x30b   :  { %v4097_v58 = vpop.eup %4096  ;;  %v371_v59 = vmul.f32 %v4095_v57, %v347_v36 }
 0x30c   :  { %v369_v61 = vmul.f32 %v4097_v58, %v345_v38 }
 0x30d   :  { %v373_v0 = vpack.c.bf16 %v371_v59, %v370_v62 }
 0x30e   :  { %v372_v63 = vpack.c.bf16 %v369_v61, %v368_v60 }
 0x310   :  { %3559 = vmatprep.mubr.bf16.mxu1 %v372_v63  ;;  %v3994_v63 = vld [vmem:[#allocation13 + $0x140] sm:$0xff]  }
 0x311   :  { %3560 = vmatmul.mubr.bf16.vlgmr.msra.gmra.mrb[0].mxu1 %v373_v0  ;;  %v3995_v0 = vld [vmem:[#allocation13 + $0x148] sm:$0xff]  }
 0x312   :  { %3595 = vmatprep.mubr.msk.bf16.mxu1 %vm288_vm0, %v4596_v14 }
 0x3e4   :  { %v3561_v1 = vpop.f32.mrb[0].mxu1 }
 0x3e5   :  { %v473_v2 = vpop.f32.mrb[1].mxu1 }
 0x3e6   :  { %v3562_v3 = vpop.f32.mrb[2].mxu1 }
 0x3e7   :  { %v489_v4 = vpack.c.bf16 %v3562_v3, %v3561_v1  ;;  %v476_v5 = vpop.f32.mrb[3].mxu1  ;;  %v3996_v1 = vld [vmem:[#allocation13 + $0x150] sm:$0xff]   ;;  %v3998_v3 = vld [vmem:[#allocation13 + $0x160] sm:$0xff]  }
 0x3e8   :  { %v488_v7 = vpack.c.bf16 %v476_v5, %v473_v2  ;;  %v3997_v2 = vld [vmem:[#allocation13 + $0x158] sm:$0xff]   ;;  %v4000_v5 = vld [vmem:[#allocation13 + $0x170] sm:$0xff]  }
 0x3ea   :  { %3563 = vmatprep.subr.bf16.mxu0 %v488_v7 }
 0x3eb   :  { %3564 = vmatpush3.bf16.msra.mxu0 %v488_v7  ;;  %v4001_v7 = vld [vmem:[#allocation13 + $0x178] sm:$0xff]  }
 0x3ec   :  { %3565 = vmatprep.subr.bf16.mxu0 %v489_v4 }
 0x3ef   :  { %3566 = vmatpush3.bf16.msra.mxu0 %v489_v4  ;;  %v3999_v4 = vld [vmem:[#allocation13 + $0x168] sm:$0xff]  }
 0x3f0   :  { %3571 = vmatprep.subr.bf16.mxu0 %v3978_v8 }
 0x3f2   :  { %3568 = vmatmul.mubr.msk.bf16.vlgmr.msra.gmra.mrb[8].mxu0 %vm288_vm0, %v4600_v21 }
 0x3f3   :  { %3572 = vmatpush3.bf16.msra.mxu0 %v3978_v8  ;;  %v148_v8 = vld [vmem:[#allocation7] sm:$0xff] }
 0x3f4   :  { %3573 = vmatprep.subr.bf16.mxu0 %v3979_v9 }
 0x3f7   :  { %3574 = vmatpush3.bf16.msra.mxu0 %v3979_v9  ;;  %v149_v9 = vld [vmem:[#allocation7 + $0x8] sm:$0xff] }
 0x3f8   :  { %3575 = vmatprep.subr.bf16.mxu0 %v3980_v10 }
 0x3fb   :  { %3576 = vmatpush3.bf16.msra.mxu0 %v3980_v10  ;;  %v4630_v10 = vpack.c.bf16 %v149_v9, %v148_v8 }
 0x3fc   :  { %3577 = vmatprep.subr.bf16.mxu0 %v3981_v11 }
 0x3ff   :  { %3578 = vmatpush3.bf16.msra.mxu0 %v3981_v11  ;;  %v4002_v11 = vld [vmem:[#allocation13 + $0x100] sm:$0xff]  }
 0x400   :  { %3579 = vmatprep.subr.bf16.mxu0 %v3982_v12 }
 0x403   :  { %3580 = vmatpush3.bf16.msra.mxu0 %v3982_v12  ;;  %v150_v12 = vld [vmem:[#allocation7 + $0x10] sm:$0xff] }
 0x404   :  { %3581 = vmatprep.subr.bf16.mxu0 %v3983_v15 }
 0x407   :  { %3582 = vmatpush3.bf16.msra.mxu0 %v3983_v15  ;;  %v151_v15 = vld [vmem:[#allocation7 + $0x18] sm:$0xff] }
 0x408   :  { %3583 = vmatprep.subr.bf16.mxu0 %v3984_v16 }
 0x40b   :  { %3584 = vmatpush3.bf16.msra.mxu0 %v3984_v16  ;;  %v4632_v16 = vpack.c.bf16 %v151_v15, %v150_v12 }
 0x40c   :  { %3585 = vmatprep.subr.bf16.mxu0 %v3985_v17 }
 0x40f   :  { %3586 = vmatpush3.bf16.msra.mxu0 %v3985_v17  ;;  %v4003_v17 = vld [vmem:[#allocation13 + $0x108] sm:$0xff]  }
 0x4c5   :  { %v3569_v19 = vpop.f32.mrb[8].mxu0 }
 0x4c6   :  { %v538_v20 = vadd.f32 %v3569_v19, %v3162_v18  ;;  %v529_v22 = vpop.f32.mrb[9].mxu0  ;;  %v4005_v19 = vld [vmem:[#allocation13 + $0x118] sm:$0xff]  }
 0x4c7   :  { %v530_v23 = vadd.f32 %v3162_v18, %v529_v22  ;;  %v3570_v24 = vpop.f32.mrb[10].mxu0  ;;  %v4007_v22 = vld [vmem:[#allocation13 + $0x128] sm:$0xff]  }
 0x4c8   :  { %v541_v25 = vadd.f32 %v3570_v24, %v3162_v18  ;;  %v532_v26 = vpop.f32.mrb[11].mxu0  ;;  %v546_v28 = vmax.f32 %v538_v20, 0.0  ;;  %v4006_v20 = vld [vmem:[#allocation13 + $0x120] sm:$0xff]   ;;  %v4009_v24 = vld [vmem:[#allocation13 + $0x138] sm:$0xff]  }
 0x4c9   :  { %v533_v27 = vadd.f32 %v3162_v18, %v532_v26  ;;  %v544_v30 = vmax.f32 %v530_v23, 0.0  ;;  %v4004_v18 = vld [vmem:[#allocation13 + $0x110] sm:$0xff]   ;;  %v4011_v26 = vld [vmem:[#allocation13 + $0x188] sm:$0xff]  }
 0x4ca   :  { %v547_v29 = vmax.f32 %v541_v25, 0.0  ;;  %v4008_v23 = vld [vmem:[#allocation13 + $0x130] sm:$0xff]   ;;  %v4010_v25 = vld [vmem:[#allocation13 + $0x180] sm:$0xff]  }
 0x4cb   :  { %v545_v31 = vmax.f32 %v533_v27, 0.0  ;;  %v4012_v27 = vld [vmem:[#allocation13 + $0x190] sm:$0xff]  }
 0x4cc   :  { %v549_v32 = vpack.c.bf16 %v547_v29, %v546_v28  ;;  %v4013_v28 = vld [vmem:[#allocation13 + $0x198] sm:$0xff]   ;;  %v4014_v29 = vld [vmem:[#allocation13 + $0x1a0] sm:$0xff]  }
 0x4cd   :  { %v548_v33 = vpack.c.bf16 %v545_v31, %v544_v30  ;;  %v4015_v30 = vld [vmem:[#allocation13 + $0x1a8] sm:$0xff]   ;;  %v4016_v31 = vld [vmem:[#allocation13 + $0x1b0] sm:$0xff]  }
 0x4cf   :  { %3587 = vmatprep.mubr.bf16.mxu0 %v548_v33 }
 0x4d0   :  { %3588 = vmatmul.mubr.bf16.vlgmr.msra.gmra.mrb[12].mxu0 %v549_v32 }
 0x4d1   :  { %3623 = vmatprep.mubr.msk.bf16.mxu0 %vm288_vm0, %v4596_v14 }
 0x5a3   :  { %v3589_v34 = vpop.f32.mrb[12].mxu0 }
 0x5a4   :  { %v649_v35 = vpop.f32.mrb[13].mxu0 }
 0x5a5   :  { %v3590_v36 = vpop.f32.mrb[14].mxu0 }
 0x5a6   :  { %v665_v37 = vpack.c.bf16 %v3590_v36, %v3589_v34  ;;  %v652_v38 = vpop.f32.mrb[15].mxu0 }
 0x5a7   :  { %v664_v39 = vpack.c.bf16 %v652_v38, %v649_v35 }
 0x5a9   :  { %3591 = vmatprep.subr.bf16.mxu1 %v664_v39 }
 0x5aa   :  { %3592 = vmatpush3.bf16.msra.mxu1 %v664_v39 }
 0x5ab   :  { %3593 = vmatprep.subr.bf16.mxu1 %v665_v37 }
 0x5ae   :  { %3594 = vmatpush3.bf16.msra.mxu1 %v665_v37 }
 0x5af   :  { %3599 = vmatprep.subr.bf16.mxu1 %v3986_v40 }
 0x5b1   :  { %3596 = vmatmul.mubr.msk.bf16.vlgmr.msra.gmra.mrb[4].mxu1 %vm288_vm0, %v4600_v21 }
 0x5b2   :  { %3600 = vmatpush3.bf16.msra.mxu1 %v3986_v40  ;;  %3615 = vmatprep.mubr.bf16.mxu1 %v548_v33  ;;  %v3184_v33 = vld [vmem:[#allocation14 + $0x3] ss:$0 sm:$0xff] }
 0x5b3   :  { %3601 = vmatprep.subr.bf16.mxu1 %v3987_v41 }
 0x5b6   :  { %3602 = vmatpush3.bf16.msra.mxu1 %v3987_v41 }
 0x5b7   :  { %3603 = vmatprep.subr.bf16.mxu1 %v3988_v42 }
 0x5ba   :  { %3604 = vmatpush3.bf16.msra.mxu1 %v3988_v42 }
 0x5bb   :  { %3605 = vmatprep.subr.bf16.mxu1 %v3989_v43 }
 0x5be   :  { %3606 = vmatpush3.bf16.msra.mxu1 %v3989_v43 }
 0x5bf   :  { %3607 = vmatprep.subr.bf16.mxu1 %v3990_v44 }
 0x5c2   :  { %3608 = vmatpush3.bf16.msra.mxu1 %v3990_v44 }
 0x5c3   :  { %3609 = vmatprep.subr.bf16.mxu1 %v3991_v45 }
 0x5c6   :  { %3610 = vmatpush3.bf16.msra.mxu1 %v3991_v45 }
 0x5c7   :  { %3611 = vmatprep.subr.bf16.mxu1 %v3992_v46 }
 0x5ca   :  { %3612 = vmatpush3.bf16.msra.mxu1 %v3992_v46 }
 0x5cb   :  { %3613 = vmatprep.subr.bf16.mxu1 %v3993_v47 }
 0x5ce   :  { %3614 = vmatpush3.bf16.msra.mxu1 %v3993_v47 }
 0x5d1   :  { %3616 = vmatmul.mubr.bf16.vlgmr.msra.gmra.mrb[8].mxu1 %v549_v32  ;;  %v4017_v32 = vld [vmem:[#allocation13 + $0x1b8] sm:$0xff]  }
 0x5d2   :  { %3691 = vmatprep.mubr.msk.bf16.mxu1 %vm288_vm0, %v4596_v14 }
 0x684   :  { %v3597_v49 = vpop.f32.mrb[4].mxu1 }
 0x685   :  { %v4616_v50 = vadd.f32 %v3597_v49, %v3173_v48  ;;  %v705_v51 = vpop.f32.mrb[5].mxu1 }
 0x686   :  { %v4618_v52 = vadd.f32 %v3173_v48, %v705_v51  ;;  %v3598_v53 = vpop.f32.mrb[6].mxu1 }
 0x687   :  { %3083 = vst [vmem:[#allocation16 + $0x30] sm:$0xff] %v4616_v50  ;;  %v4621_v54 = vadd.f32 %v3598_v53, %v3173_v48  ;;  %v708_v55 = vpop.f32.mrb[7].mxu1 }
 0x688   :  { %3081 = vst [vmem:[#allocation16 + $0x20] sm:$0xff] %v4618_v52  ;;  %v4624_v56 = vadd.f32 %v3173_v48, %v708_v55 }
 0x689   :  { %3084 = vst [vmem:[#allocation16 + $0x38] sm:$0xff] %v4621_v54 }
 0x68a   :  { %3082 = vst [vmem:[#allocation16 + $0x28] sm:$0xff] %v4624_v56 }
 0x6a4   :  { %v3617_v57 = vpop.f32.mrb[8].mxu1 }
 0x6a5   :  { %v819_v58 = vpop.f32.mrb[9].mxu1 }
 0x6a6   :  { %v3618_v59 = vpop.f32.mrb[10].mxu1 }
 0x6a7   :  { %v835_v60 = vpack.c.bf16 %v3618_v59, %v3617_v57  ;;  %v822_v61 = vpop.f32.mrb[11].mxu1 }
 0x6a8   :  { %v834_v62 = vpack.c.bf16 %v822_v61, %v819_v58 }
 0x6aa   :  { %3619 = vmatprep.subr.bf16.mxu0 %v834_v62 }
 0x6ab   :  { %3620 = vmatpush3.bf16.msra.mxu0 %v834_v62 }
 0x6ac   :  { %3621 = vmatprep.subr.bf16.mxu0 %v835_v60 }
 0x6af   :  { %3622 = vmatpush3.bf16.msra.mxu0 %v835_v60 }
 0x6b0   :  { %3627 = vmatprep.subr.bf16.mxu0 %v3994_v63 }
 0x6b2   :  { %3624 = vmatmul.mubr.msk.bf16.vlgmr.msra.gmra.mrb[16].mxu0 %vm288_vm0, %v4600_v21 }
 0x6b3   :  { %3628 = vmatpush3.bf16.msra.mxu0 %v3994_v63  ;;  %3643 = vmatprep.mubr.bf16.mxu0 %v4630_v10 }
 0x6b4   :  { %3629 = vmatprep.subr.bf16.mxu0 %v3995_v0 }
 0x6b7   :  { %3630 = vmatpush3.bf16.msra.mxu0 %v3995_v0 }
 0x6b8   :  { %3631 = vmatprep.subr.bf16.mxu0 %v3996_v1 }
 0x6bb   :  { %3632 = vmatpush3.bf16.msra.mxu0 %v3996_v1 }
 0x6bc   :  { %3633 = vmatprep.subr.bf16.mxu0 %v3997_v2 }
 0x6bf   :  { %3634 = vmatpush3.bf16.msra.mxu0 %v3997_v2 }
 0x6c0   :  { %3635 = vmatprep.subr.bf16.mxu0 %v3998_v3 }
 0x6c3   :  { %3636 = vmatpush3.bf16.msra.mxu0 %v3998_v3 }
 0x6c4   :  { %3637 = vmatprep.subr.bf16.mxu0 %v3999_v4 }
 0x6c7   :  { %3638 = vmatpush3.bf16.msra.mxu0 %v3999_v4 }
 0x6c8   :  { %3639 = vmatprep.subr.bf16.mxu0 %v4000_v5 }
 0x6cb   :  { %3640 = vmatpush3.bf16.msra.mxu0 %v4000_v5 }
 0x6cc   :  { %3641 = vmatprep.subr.bf16.mxu0 %v4001_v7 }
 0x6cf   :  { %3642 = vmatpush3.bf16.msra.mxu0 %v4001_v7 }
 0x6d0   :  { %3647 = vmatprep.subr.bf16.mxu0 %v4002_v11 }
 0x6d2   :  { %3644 = vmatmul.mubr.bf16.vlgmr.msra.gmra.mrb[20].mxu0 %v4632_v16 }
 0x6d3   :  { %3648 = vmatpush3.bf16.msra.mxu0 %v4002_v11  ;;  %3663 = vmatprep.mubr.bf16.mxu0 %v4590_v6 }
 0x6d4   :  { %3649 = vmatprep.subr.bf16.mxu0 %v4003_v17 }
 0x6d7   :  { %3650 = vmatpush3.bf16.msra.mxu0 %v4003_v17 }
 0x6d8   :  { %3651 = vmatprep.subr.bf16.mxu0 %v4004_v18 }
 0x6db   :  { %3652 = vmatpush3.bf16.msra.mxu0 %v4004_v18 }
 0x6dc   :  { %3653 = vmatprep.subr.bf16.mxu0 %v4005_v19 }
 0x6df   :  { %3654 = vmatpush3.bf16.msra.mxu0 %v4005_v19 }
 0x6e0   :  { %3655 = vmatprep.subr.bf16.mxu0 %v4006_v20 }
 0x6e3   :  { %3656 = vmatpush3.bf16.msra.mxu0 %v4006_v20 }
 0x6e4   :  { %3657 = vmatprep.subr.bf16.mxu0 %v4007_v22 }
 0x6e7   :  { %3658 = vmatpush3.bf16.msra.mxu0 %v4007_v22 }
 0x6e8   :  { %3659 = vmatprep.subr.bf16.mxu0 %v4008_v23 }
 0x6eb   :  { %3660 = vmatpush3.bf16.msra.mxu0 %v4008_v23 }
 0x6ec   :  { %3661 = vmatprep.subr.bf16.mxu0 %v4009_v24 }
 0x6ef   :  { %3662 = vmatpush3.bf16.msra.mxu0 %v4009_v24 }
 0x6f0   :  { %3667 = vmatprep.subr.bf16.mxu0 %v4010_v25 }
 0x6f2   :  { %3664 = vmatmul.mubr.bf16.vlgmr.msra.gmra.mrb[20].mxu0 %v4593_v13 }
 0x6f3   :  { %3668 = vmatpush3.bf16.msra.mxu0 %v4010_v25 }
 0x6f4   :  { %3669 = vmatprep.subr.bf16.mxu0 %v4011_v26 }
 0x6f7   :  { %3670 = vmatpush3.bf16.msra.mxu0 %v4011_v26 }
 0x6f8   :  { %3671 = vmatprep.subr.bf16.mxu0 %v4012_v27 }
 0x6fb   :  { %3672 = vmatpush3.bf16.msra.mxu0 %v4012_v27 }
 0x6fc   :  { %3673 = vmatprep.subr.bf16.mxu0 %v4013_v28 }
 0x6ff   :  { %3674 = vmatpush3.bf16.msra.mxu0 %v4013_v28 }
 0x700   :  { %3675 = vmatprep.subr.bf16.mxu0 %v4014_v29 }
 0x703   :  { %3676 = vmatpush3.bf16.msra.mxu0 %v4014_v29 }
 0x704   :  { %3677 = vmatprep.subr.bf16.mxu0 %v4015_v30 }
 0x707   :  { %3678 = vmatpush3.bf16.msra.mxu0 %v4015_v30 }
 0x708   :  { %3679 = vmatprep.subr.bf16.mxu0 %v4016_v31 }
 0x70b   :  { %3680 = vmatpush3.bf16.msra.mxu0 %v4016_v31 }
 0x70c   :  { %3681 = vmatprep.subr.bf16.mxu0 %v4017_v32 }
 0x70f   :  { %3682 = vmatpush3.bf16.msra.mxu0 %v4017_v32 }
 0x785   :  { %v3625_v34 = vpop.f32.mrb[16].mxu0 }
 0x786   :  { %v4638_v35 = vadd.f32 %v3625_v34, %v3184_v33  ;;  %v875_v36 = vpop.f32.mrb[17].mxu0 }
 0x787   :  { %v4640_v37 = vadd.f32 %v3184_v33, %v875_v36  ;;  %v3626_v38 = vpop.f32.mrb[18].mxu0 }
 0x788   :  { %v904_v39 = vand.u32 2147483647, %v4638_v35  ;;  %v4643_v40 = vadd.f32 %v3626_v38, %v3184_v33  ;;  %v878_v41 = vpop.f32.mrb[19].mxu0  ;;  %v892_v17 = vmax.f32 %v4638_v35, 0.0  ;;  %vm896_vm1 = vcmp.ne.f32.partialorder %v4638_v35, %v4638_v35 }
 0x789   :  { %v902_v42 = vand.u32 2147483647, %v4640_v37  ;;  %v4646_v43 = vadd.f32 %v3184_v33, %v878_v41  ;;  %v890_v18 = vmax.f32 %v4640_v37, 0.0  ;;  %vm894_vm2 = vcmp.ne.f32.partialorder %v4640_v37, %v4640_v37 }
 0x78a   :  { %v908_v44 = vsub.f32 0.0, %v904_v39  ;;  %v905_v45 = vand.u32 2147483647, %v4643_v40  ;;  %v893_v36 = vmax.f32 %v4643_v40, 0.0  ;;  %vm897_vm7 = vcmp.ne.f32.partialorder %v4643_v40, %v4643_v40 }
 0x78b   :  { %v906_v46 = vsub.f32 0.0, %v902_v42  ;;  %v903_v47 = vand.u32 2147483647, %v4646_v43  ;;  %vm895_vm8 = vcmp.ne.f32.partialorder %v4646_v43, %v4646_v43 }
 0x78c   :  { %v914_v48 = vmul.f32 1.442695, %v908_v44  ;;  %v909_v49 = vsub.f32 0.0, %v905_v45 }
 0x78d   :  { %v910_v51 = vmul.f32 1.442695, %v906_v46  ;;  %v907_v53 = vsub.f32 0.0, %v903_v47  ;;  %v891_v46 = vmax.f32 %v4646_v43, 0.0 }
 0x78e   :  { %4098 = vpow2.f32 %v914_v48  ;;  %v916_v55 = vmul.f32 1.442695, %v909_v49 }
 0x78f   :  { %4100 = vpow2.f32 %v910_v51  ;;  %v912_v57 = vmul.f32 1.442695, %v907_v53 }
 0x790   :  { %4102 = vpow2.f32 %v916_v55 }
 0x791   :  { %4104 = vpow2.f32 %v912_v57 }
 0x798   :  { %v4099_v58 = vpop.eup %4098 }
 0x799   :  { %v4101_v59 = vpop.eup %4100  ;;  %v936_v60 = vadd.f32 1.0, %v4099_v58  ;;  %v939_v2 = vmul.f32 -0.5, %v4099_v58  ;;  %v942_v8 = vand.u32 2147483647, %v4099_v58 }
 0x79a   :  { %v4103_v61 = vpop.eup %4102  ;;  %v918_v62 = vadd.f32 1.0, %v4101_v59  ;;  %v921_v3 = vmul.f32 -0.5, %v4101_v59  ;;  %v924_v11 = vand.u32 2147483647, %v4101_v59 }
 0x79b   :  { %v4105_v63 = vpop.eup %4104  ;;  %4106 = vlog2.f32 %v936_v60  ;;  %v945_v0 = vadd.f32 1.0, %v4103_v61  ;;  %v948_v4 = vmul.f32 -0.5, %v4103_v61  ;;  %v940_v5 = vadd.f32 1.0, %v939_v2 }
 0x79c   :  { %4108 = vlog2.f32 %v918_v62  ;;  %v927_v1 = vadd.f32 1.0, %v4105_v63  ;;  %v930_v7 = vmul.f32 -0.5, %v4105_v63  ;;  %v922_v9 = vadd.f32 1.0, %v921_v3  ;;  %v154_v62 = vld [vmem:[#allocation8 + $0x10] sm:$0xff] }
 0x79d   :  { %4110 = vlog2.f32 %v945_v0  ;;  %v949_v12 = vadd.f32 1.0, %v948_v4  ;;  %v951_v19 = vand.u32 2147483647, %v4103_v61  ;;  %v941_v23 = vmul.f32 %v4099_v58, %v940_v5  ;;  %v155_v0 = vld [vmem:[#allocation8 + $0x18] sm:$0xff]  ;;  %v153_v4 = vld [vmem:[#allocation8 + $0x8] sm:$0xff] }
 0x79e   :  { %4112 = vlog2.f32 %v927_v1  ;;  %v931_v24 = vadd.f32 1.0, %v930_v7  ;;  %vm943_vm3 = vcmp.lt.f32.partialorder %v942_v8, 0.0004427343  ;;  %v923_v27 = vmul.f32 %v4101_v59, %v922_v9 }
 0x79f   :  { %v933_v28 = vand.u32 2147483647, %v4105_v63  ;;  %vm925_vm4 = vcmp.lt.f32.partialorder %v924_v11, 0.0004427343  ;;  %v950_v31 = vmul.f32 %v4103_v61, %v949_v12  ;;  %vm952_vm5 = vcmp.lt.f32.partialorder %v951_v19, 0.0004427343 }
 0x7a0   :  { %v932_v42 = vmul.f32 %v4105_v63, %v931_v24  ;;  %v4020_v24 = vld [vmem:[#allocation13 + $0x1d0] sm:$0xff]  }
 0x7a1   :  { %vm934_vm6 = vcmp.lt.f32.partialorder %v933_v28, 0.0004427343 }
 0x7a5   :  { %v4107_v15 = vpop.eup %4106 }
 0x7a6   :  { %v4109_v20 = vpop.eup %4108  ;;  %v938_v22 = vmul.f32 0.6931472, %v4107_v15 }
 0x7a7   :  { %v4111_v25 = vpop.eup %4110  ;;  %v920_v26 = vmul.f32 0.6931472, %v4109_v20 }
 0x7a8   :  { %v944_v29 = vsel %vm943_vm3, %v941_v23, %v938_v22  ;;  %v947_v30 = vmul.f32 0.6931472, %v4111_v25  ;;  %v4113_v32 = vpop.eup %4112  ;;  %v3211_v25 = vld [vmem:[#allocation14 + $0x4] ss:$0 sm:$0xff] }
 0x7a9   :  { %v956_v33 = vadd.f32 %v944_v29, %v892_v17  ;;  %v926_v34 = vsel %vm925_vm4, %v923_v27, %v920_v26  ;;  %v929_v41 = vmul.f32 0.6931472, %v4113_v32 }
 0x7aa   :  { %v954_v38 = vadd.f32 %v926_v34, %v890_v18  ;;  %v953_v39 = vsel %vm952_vm5, %v950_v31, %v947_v30 }
 0x7ab   :  { %v960_v44 = vsel %vm896_vm1, %v4638_v35, %v956_v33  ;;  %v957_v45 = vadd.f32 %v953_v39, %v893_v36  ;;  %v935_v49 = vsel %vm934_vm6, %v932_v42, %v929_v41 }
 0x7ac   :  { %v964_v47 = vmul.f32 0.5, %v960_v44  ;;  %3088 = vst [vmem:[#allocation16 + $0x50] sm:$0xff] %v960_v44  ;;  %v958_v48 = vsel %vm894_vm2, %v4640_v37, %v954_v38  ;;  %v955_v35 = vadd.f32 %v935_v49, %v891_v46  ;;  %v4021_v46 = vld [vmem:[#allocation13 + $0x1d8] sm:$0xff]   ;;  %v4024_v49 = vld [vmem:[#allocation13 + $0x1f0] sm:$0xff]  }
 0x7ad   :  { %v962_v51 = vmul.f32 0.5, %v958_v48  ;;  %3086 = vst [vmem:[#allocation16 + $0x40] sm:$0xff] %v958_v48  ;;  %v961_v53 = vsel %vm897_vm7, %v4643_v40, %v957_v45  ;;  %v152_v40 = vld [vmem:[#allocation8] sm:$0xff]  ;;  %v4023_v48 = vld [vmem:[#allocation13 + $0x1e8] sm:$0xff]  }
 0x7ae   :  { %v970_v55 = vmul.f32 1.442695, %v964_v47  ;;  %v965_v57 = vmul.f32 0.5, %v961_v53  ;;  %3089 = vst [vmem:[#allocation16 + $0x58] sm:$0xff] %v961_v53  ;;  %v959_v59 = vsel %vm895_vm8, %v4646_v43, %v955_v35  ;;  %v4022_v47 = vld [vmem:[#allocation13 + $0x1e0] sm:$0xff]  }
 0x7af   :  { %v966_v58 = vmul.f32 1.442695, %v962_v51  ;;  %v963_v60 = vmul.f32 0.5, %v959_v59  ;;  %3087 = vst [vmem:[#allocation16 + $0x48] sm:$0xff] %v959_v59  ;;  %v4025_v51 = vld [vmem:[#allocation13 + $0x1f8] sm:$0xff]  }
 0x7b0   :  { %4114 = vpow2.f32 %v970_v55  ;;  %v972_v37 = vmul.f32 1.442695, %v965_v57 }
 0x7b1   :  { %4116 = vpow2.f32 %v966_v58  ;;  %v968_v61 = vmul.f32 1.442695, %v963_v60 }
 0x7b2   :  { %4118 = vpow2.f32 %v972_v37 }
 0x7b3   :  { %4120 = vpow2.f32 %v968_v61 }
 0x7ba   :  { %v4115_v63 = vpop.eup %4114 }
 0x7bb   :  { %v4117_v1 = vpop.eup %4116  ;;  %v976_v2 = vmul.f32 %v4115_v63, %v154_v62 }
 0x7bc   :  { %v4119_v3 = vpop.eup %4118  ;;  %v974_v5 = vmul.f32 %v4117_v1, %v152_v40 }
 0x7bd   :  { %v977_v7 = vmul.f32 %v4119_v3, %v155_v0  ;;  %v980_v43 = vadd.f32 %v976_v2, %v4616_v50  ;;  %v4121_v8 = vpop.eup %4120 }
 0x7be   :  { %v978_v9 = vadd.f32 %v974_v5, %v4618_v52  ;;  %v975_v11 = vmul.f32 %v4121_v8, %v153_v4 }
 0x7bf   :  { %v981_v12 = vadd.f32 %v977_v7, %v4621_v54  ;;  %3078 = vst [vmem:[#allocation16 + $0x10] sm:$0xff] %v980_v43  ;;  %v4018_v54 = vld [vmem:[#allocation13 + $0x1c0] sm:$0xff]  }
 0x7c0   :  { %3076 = vst [vmem:[#allocation16] sm:$0xff] %v978_v9  ;;  %v979_v15 = vadd.f32 %v975_v11, %v4624_v56  ;;  %v4019_v56 = vld [vmem:[#allocation13 + $0x1c8] sm:$0xff]  }
 0x7c1   :  { %v1217_v17 = vpack.c.bf16 %v981_v12, %v980_v43  ;;  %3079 = vst [vmem:[#allocation16 + $0x18] sm:$0xff] %v981_v12 }
 0x7c2   :  { %v1216_v18 = vpack.c.bf16 %v979_v15, %v978_v9  ;;  %3077 = vst [vmem:[#allocation16 + $0x8] sm:$0xff] %v979_v15  ;;  %v4026_v15 = vld [vmem:[#allocation13 + $0x200] sm:$0xff]  }
 0x7c4   :  { %3683 = vmatprep.mubr.bf16.mxu0 %v1216_v18  ;;  %v4028_v18 = vld [vmem:[#allocation13 + $0x210] sm:$0xff]  }
 0x7c5   :  { %3684 = vmatmul.mubr.bf16.vlgmr.msra.gmra.mrb[20].mxu0 %v1217_v17  ;;  %v4027_v17 = vld [vmem:[#allocation13 + $0x208] sm:$0xff]  }
 0x7c6   :  { %3775 = vmatprep.mubr.msk.bf16.mxu0 %vm288_vm0, %v4596_v14 }
 0x898   :  { %v3685_v50 = vpop.f32.mrb[20].mxu0 }
 0x899   :  { %v1317_v19 = vpop.f32.mrb[21].mxu0 }
 0x89a   :  { %v3686_v20 = vpop.f32.mrb[22].mxu0 }
 0x89b   :  { %v1337_v52 = vpack.c.bf16 %v3686_v20, %v3685_v50  ;;  %v1320_v22 = vpop.f32.mrb[23].mxu0  ;;  %v4030_v50 = vld [vmem:[#allocation13 + $0x220] sm:$0xff]   ;;  %v4032_v20 = vld [vmem:[#allocation13 + $0x230] sm:$0xff]  }
 0x89c   :  { %v1336_v23 = vpack.c.bf16 %v1320_v22, %v1317_v19  ;;  %v4031_v19 = vld [vmem:[#allocation13 + $0x228] sm:$0xff]  }
 0x89e   :  { %3687 = vmatprep.subr.bf16.mxu1 %v1336_v23 }
 0x89f   :  { %3688 = vmatpush3.bf16.msra.mxu1 %v1336_v23 }
 0x8a0   :  { %3689 = vmatprep.subr.bf16.mxu1 %v1337_v52 }
 0x8a3   :  { %3690 = vmatpush3.bf16.msra.mxu1 %v1337_v52  ;;  %v4033_v52 = vld [vmem:[#allocation13 + $0x238] sm:$0xff]  }
 0x8a4   :  { %3695 = vmatprep.subr.bf16.mxu1 %v4018_v54 }
 0x8a6   :  { %3692 = vmatmul.mubr.msk.bf16.vlgmr.msra.gmra.mrb[12].mxu1 %vm288_vm0, %v4600_v21 }
 0x8a7   :  { %3696 = vmatpush3.bf16.msra.mxu1 %v4018_v54 }
 0x8a8   :  { %3697 = vmatprep.subr.bf16.mxu1 %v4019_v56 }
 0x8ab   :  { %3698 = vmatpush3.bf16.msra.mxu1 %v4019_v56 }
 0x8ac   :  { %3699 = vmatprep.subr.bf16.mxu1 %v4020_v24 }
 0x8af   :  { %3700 = vmatpush3.bf16.msra.mxu1 %v4020_v24 }
 0x8b0   :  { %3701 = vmatprep.subr.bf16.mxu1 %v4021_v46 }
 0x8b3   :  { %3702 = vmatpush3.bf16.msra.mxu1 %v4021_v46  ;;  %v4035_v46 = vld [vmem:[#allocation13 + $0x248] sm:$0xff]  }
 0x8b4   :  { %3703 = vmatprep.subr.bf16.mxu1 %v4022_v47 }
 0x8b7   :  { %3704 = vmatpush3.bf16.msra.mxu1 %v4022_v47  ;;  %v4688_v47 = vld [vmem:[#allocation2 + $0x8] sm:$0xff]  }
 0x8b8   :  { %3705 = vmatprep.subr.bf16.mxu1 %v4023_v48 }
 0x8bb   :  { %3706 = vmatpush3.bf16.msra.mxu1 %v4023_v48  ;;  %v4036_v48 = vld [vmem:[#allocation13 + $0x250] sm:$0xff]  }
 0x8bc   :  { %3707 = vmatprep.subr.bf16.mxu1 %v4024_v49 }
 0x8bf   :  { %3708 = vmatpush3.bf16.msra.mxu1 %v4024_v49  ;;  %v4037_v49 = vld [vmem:[#allocation13 + $0x258] sm:$0xff]  }
 0x8c0   :  { %3709 = vmatprep.subr.bf16.mxu1 %v4025_v51 }
 0x8c3   :  { %3710 = vmatpush3.bf16.msra.mxu1 %v4025_v51  ;;  %v4038_v51 = vld [vmem:[#allocation13 + $0x260] sm:$0xff]  }
 0x979   :  { %v3693_v26 = vpop.f32.mrb[12].mxu1 }
 0x97a   :  { %v1377_v27 = vpop.f32.mrb[13].mxu1  ;;  %v1386_v28 = vadd.f32 %v3693_v26, %v3211_v25 }
 0x97b   :  { %v1378_v29 = vadd.f32 %v3211_v25, %v1377_v27  ;;  %v3694_v30 = vpop.f32.mrb[14].mxu1 }
 0x97c   :  { %v1380_v31 = vpop.f32.mrb[15].mxu1  ;;  %v1389_v33 = vadd.f32 %v3694_v30, %v3211_v25  ;;  %v1394_v36 = vmax.f32 %v1386_v28, 0.0 }
 0x97d   :  { %v1392_v32 = vmax.f32 %v1378_v29, 0.0  ;;  %v1381_v34 = vadd.f32 %v3211_v25, %v1380_v31 }
 0x97e   :  { %v1395_v41 = vmax.f32 %v1389_v33, 0.0  ;;  %v1398_v44 = vmul.f32 %v1394_v36, %v1394_v36 }
 0x97f   :  { %v1393_v38 = vmax.f32 %v1381_v34, 0.0  ;;  %v1396_v39 = vmul.f32 %v1392_v32, %v1392_v32  ;;  %v4684_v34 = vld [vmem:[#allocation2] sm:$0xff]  }
 0x980   :  { %v1399_v45 = vmul.f32 %v1395_v41, %v1395_v41 }
 0x981   :  { %1400 = vadd.xlane.f32.xlu0 %v1396_v39  ;;  %v1397_v42 = vmul.f32 %v1393_v38, %v1393_v38 }
 0x983   :  { %1402 = vadd.xlane.f32.xlu1 %v1397_v42 }
 0x985   :  { %1404 = vadd.xlane.f32.xlu0 %v1398_v44 }
 0x987   :  { %1406 = vadd.xlane.f32.xlu1 %v1399_v45  ;;  %v4034_v45 = vld [vmem:[#allocation13 + $0x240] sm:$0xff]  }
 0xa0e   :  { %v1401_v53 = vpop.xlane.xlu0 %1400 }
 0xa0f   :  { %v1408_v35 = vmax.f32 %v1401_v53, 1e-24  ;;  %v4039_v53 = vld [vmem:[#allocation13 + $0x268] sm:$0xff]  }
 0xa10   :  { %v1403_v55 = vpop.xlane.xlu1 %1402 }
 0xa11   :  { %4122 = vrsqrt.f32 %v1408_v35  ;;  %v1409_v57 = vmax.f32 %v1403_v55, 1e-24  ;;  %v4040_v35 = vld [vmem:[#allocation13 + $0x270] sm:$0xff]   ;;  %v4041_v55 = vld [vmem:[#allocation13 + $0x278] sm:$0xff]  }
 0xa12   :  { %v1405_v58 = vpop.xlane.xlu0 %1404 }
 0xa13   :  { %4124 = vrsqrt.f32 %v1409_v57  ;;  %v1410_v59 = vmax.f32 %v1405_v58, 1e-24  ;;  %v3233_v57 = vld [vmem:[#allocation14 + $0x6] ss:$0 sm:$0xff] }
 0xa14   :  { %v1407_v37 = vpop.xlane.xlu1 %1406 }
 0xa15   :  { %4126 = vrsqrt.f32 %v1410_v59  ;;  %v1411_v60 = vmax.f32 %v1407_v37, 1e-24 }
 0xa17   :  { %4128 = vrsqrt.f32 %v1411_v60 }
 0xa1b   :  { %v4123_v61 = vpop.eup %4122 }
 0xa1c   :  { %v1416_v40 = vmul.f32 %v4123_v61, %v1392_v32 }
 0xa1d   :  { %v4125_v62 = vpop.eup %4124 }
 0xa1e   :  { %v1417_v63 = vmul.f32 %v4125_v62, %v1393_v38 }
 0xa1f   :  { %v4127_v0 = vpop.eup %4126 }
 0xa20   :  { %v1420_v1 = vpack.c.bf16 %v1417_v63, %v1416_v40  ;;  %v1418_v3 = vmul.f32 %v4127_v0, %v1394_v36 }
 0xa21   :  { %v4129_v2 = vpop.eup %4128 }
 0xa22   :  { %3711 = vmatprep.mubr.bf16.mxu1 %v1420_v1  ;;  %v1419_v4 = vmul.f32 %v4129_v2, %v1395_v41 }
 0xa24   :  { %v1421_v5 = vpack.c.bf16 %v1419_v4, %v1418_v3 }
 0xa26   :  { %3712 = vmatmul.mubr.bf16.vlgmr.msra.gmra.mrb[16].mxu1 %v1421_v5 }
 0xa27   :  { %3719 = vmatprep.mubr.msk.bf16.mxu1 %vm288_vm0, %v4596_v14  ;;  %v4029_v14 = vld [vmem:[#allocation13 + $0x218] sm:$0xff]  }
 0xaf9   :  { %v3713_v7 = vpop.f32.mrb[16].mxu1 }
 0xafa   :  { %v1521_v43 = vpop.f32.mrb[17].mxu1 }
 0xafb   :  { %v3714_v8 = vpop.f32.mrb[18].mxu1 }
 0xafc   :  { %v1537_v9 = vpack.c.bf16 %v3714_v8, %v3713_v7  ;;  %v1524_v11 = vpop.f32.mrb[19].mxu1  ;;  %v4042_v7 = vld [vmem:[#allocation13 + $0x2c0] sm:$0xff]   ;;  %v4044_v8 = vld [vmem:[#allocation13 + $0x2d0] sm:$0xff]  }
 0xafd   :  { %v1536_v12 = vpack.c.bf16 %v1524_v11, %v1521_v43  ;;  %v4043_v43 = vld [vmem:[#allocation13 + $0x2c8] sm:$0xff]   ;;  %v4046_v11 = vld [vmem:[#allocation13 + $0x2e0] sm:$0xff]  }
 0xaff   :  { %3715 = vmatprep.subr.bf16.mxu1 %v1536_v12 }
 0xb00   :  { %3716 = vmatpush3.bf16.msra.mxu1 %v1536_v12  ;;  %v4047_v12 = vld [vmem:[#allocation13 + $0x2e8] sm:$0xff]  }
 0xb01   :  { %3717 = vmatprep.subr.bf16.mxu1 %v1537_v9 }
 0xb04   :  { %3718 = vmatpush3.bf16.msra.mxu1 %v1537_v9  ;;  %v4045_v9 = vld [vmem:[#allocation13 + $0x2d8] sm:$0xff]  }
 0xb05   :  { %3723 = vmatprep.subr.bf16.mxu1 %v4026_v15 }
 0xb07   :  { %3720 = vmatmul.mubr.msk.bf16.vlgmr.msra.gmra.mrb[20].mxu1 %vm288_vm0, %v4600_v21  ;;  %v3222_v21 = vld [vmem:[#allocation14 + $0x5] ss:$0 sm:$0xff] }
 0xb08   :  { %3724 = vmatpush3.bf16.msra.mxu1 %v4026_v15  ;;  %v4048_v15 = vld [vmem:[#allocation13 + $0x2f0] sm:$0xff]  }
 0xb09   :  { %3725 = vmatprep.subr.bf16.mxu1 %v4027_v17 }
 0xb0c   :  { %3726 = vmatpush3.bf16.msra.mxu1 %v4027_v17  ;;  %v4049_v17 = vld [vmem:[#allocation13 + $0x2f8] sm:$0xff]  }
 0xb0d   :  { %3727 = vmatprep.subr.bf16.mxu1 %v4028_v18 }
 0xb10   :  { %3728 = vmatpush3.bf16.msra.mxu1 %v4028_v18  ;;  %v4051_v18 = vld [vmem:[#allocation13 + $0x288] sm:$0xff]  }
 0xb11   :  { %3729 = vmatprep.subr.bf16.mxu1 %v4029_v14 }
 0xb14   :  { %3730 = vmatpush3.bf16.msra.mxu1 %v4029_v14  ;;  %v4052_v14 = vld [vmem:[#allocation13 + $0x290] sm:$0xff]  }
 0xb15   :  { %3731 = vmatprep.subr.bf16.mxu1 %v4030_v50 }
 0xb18   :  { %3732 = vmatpush3.bf16.msra.mxu1 %v4030_v50  ;;  %v4053_v50 = vld [vmem:[#allocation13 + $0x298] sm:$0xff]  }
 0xb19   :  { %3733 = vmatprep.subr.bf16.mxu1 %v4031_v19 }
 0xb1c   :  { %3734 = vmatpush3.bf16.msra.mxu1 %v4031_v19  ;;  %v4054_v19 = vld [vmem:[#allocation13 + $0x2a0] sm:$0xff]  }
 0xb1d   :  { %3735 = vmatprep.subr.bf16.mxu1 %v4032_v20 }
 0xb20   :  { %3736 = vmatpush3.bf16.msra.mxu1 %v4032_v20  ;;  %v4055_v20 = vld [vmem:[#allocation13 + $0x2a8] sm:$0xff]  }
 0xb21   :  { %3737 = vmatprep.subr.bf16.mxu1 %v4033_v52 }
 0xb24   :  { %3738 = vmatpush3.bf16.msra.mxu1 %v4033_v52  ;;  %v4058_v52 = vld [vmem:[#allocation13 + $0x300] sm:$0xff]  }
 0xbda   :  { %v3721_v22 = vpop.f32.mrb[20].mxu1 }
 0xbdb   :  { %v1586_v23 = vadd.f32 %v3721_v22, %v3222_v21  ;;  %v1577_v54 = vpop.f32.mrb[21].mxu1  ;;  %v4060_v22 = vld [vmem:[#allocation13 + $0x310] sm:$0xff]  }
 0xbdc   :  { %v1578_v56 = vadd.f32 %v3222_v21, %v1577_v54  ;;  %v3722_v24 = vpop.f32.mrb[22].mxu1  ;;  %v4062_v54 = vld [vmem:[#allocation13 + $0x320] sm:$0xff]  }
 0xbdd   :  { %v1589_v25 = vadd.f32 %v3722_v24, %v3222_v21  ;;  %v1580_v26 = vpop.f32.mrb[23].mxu1  ;;  %v1594_v28 = vmax.f32 %v1586_v23, 0.0  ;;  %v4061_v23 = vld [vmem:[#allocation13 + $0x318] sm:$0xff]   ;;  %v4064_v24 = vld [vmem:[#allocation13 + $0x330] sm:$0xff]  }
 0xbde   :  { %v1581_v27 = vadd.f32 %v3222_v21, %v1580_v26  ;;  %v1592_v30 = vmax.f32 %v1578_v56, 0.0  ;;  %v4059_v21 = vld [vmem:[#allocation13 + $0x308] sm:$0xff]  }
 0xbdf   :  { %v1595_v29 = vmax.f32 %v1589_v25, 0.0  ;;  %v4063_v56 = vld [vmem:[#allocation13 + $0x328] sm:$0xff]   ;;  %v4065_v25 = vld [vmem:[#allocation13 + $0x338] sm:$0xff]  }
 0xbe0   :  { %v1593_v31 = vmax.f32 %v1581_v27, 0.0 }
 0xbe1   :  { %v1597_v32 = vpack.c.bf16 %v1595_v29, %v1594_v28 }
 0xbe2   :  { %v1596_v33 = vpack.c.bf16 %v1593_v31, %v1592_v30 }
 0xbe4   :  { %3739 = vmatprep.mubr.bf16.mxu1 %v1596_v33 }
 0xbe5   :  { %3740 = vmatmul.mubr.bf16.vlgmr.msra.gmra.mrb[24].mxu1 %v1597_v32 }
 0xbe6   :  { %3747 = vmatprep.mubr.msk.bf16.mxu1 %vm288_vm0, %v4684_v34 }
 0xcb8   :  { %v3741_v36 = vpop.f32.mrb[24].mxu1 }
 0xcb9   :  { %v1697_v38 = vpop.f32.mrb[25].mxu1 }
 0xcba   :  { %v3742_v39 = vpop.f32.mrb[26].mxu1 }
 0xcbb   :  { %v1713_v41 = vpack.c.bf16 %v3742_v39, %v3741_v36  ;;  %v1700_v42 = vpop.f32.mrb[27].mxu1 }
 0xcbc   :  { %v1712_v44 = vpack.c.bf16 %v1700_v42, %v1697_v38 }
 0xcbe   :  { %3743 = vmatprep.subr.bf16.mxu1 %v1712_v44 }
 0xcbf   :  { %3744 = vmatpush3.bf16.msra.mxu1 %v1712_v44 }
 0xcc0   :  { %3745 = vmatprep.subr.bf16.mxu1 %v1713_v41 }
 0xcc3   :  { %3746 = vmatpush3.bf16.msra.mxu1 %v1713_v41 }
 0xcc4   :  { %3751 = vmatprep.subr.bf16.mxu1 %v4034_v45 }
 0xcc6   :  { %3748 = vmatmul.mubr.msk.bf16.vlgmr.msra.gmra.mrb[28].mxu1 %vm288_vm0, %v4688_v47 }
 0xcc7   :  { %3752 = vmatpush3.bf16.msra.mxu1 %v4034_v45  ;;  %3767 = vmatprep.mubr.bf16.mxu1 %v1596_v33 }
 0xcc8   :  { %3753 = vmatprep.subr.bf16.mxu1 %v4035_v46 }
 0xccb   :  { %3754 = vmatpush3.bf16.msra.mxu1 %v4035_v46 }
 0xccc   :  { %3755 = vmatprep.subr.bf16.mxu1 %v4036_v48 }
 0xccf   :  { %3756 = vmatpush3.bf16.msra.mxu1 %v4036_v48 }
 0xcd0   :  { %3757 = vmatprep.subr.bf16.mxu1 %v4037_v49 }
 0xcd3   :  { %3758 = vmatpush3.bf16.msra.mxu1 %v4037_v49 }
 0xcd4   :  { %3759 = vmatprep.subr.bf16.mxu1 %v4038_v51 }
 0xcd7   :  { %3760 = vmatpush3.bf16.msra.mxu1 %v4038_v51 }
 0xcd8   :  { %3761 = vmatprep.subr.bf16.mxu1 %v4039_v53 }
 0xcdb   :  { %3762 = vmatpush3.bf16.msra.mxu1 %v4039_v53 }
 0xcdc   :  { %3763 = vmatprep.subr.bf16.mxu1 %v4040_v35 }
 0xcdf   :  { %3764 = vmatpush3.bf16.msra.mxu1 %v4040_v35 }
 0xce0   :  { %3765 = vmatprep.subr.bf16.mxu1 %v4041_v55 }
 0xce3   :  { %3766 = vmatpush3.bf16.msra.mxu1 %v4041_v55 }
 0xce6   :  { %3768 = vmatmul.mubr.bf16.vlgmr.msra.gmra.mrb[32].mxu1 %v1597_v32 }
 0xce7   :  { %3843 = vmatprep.mubr.msk.bf16.mxu1 %vm288_vm0, %v4684_v34 }
 0xd99   :  { %v3749_v58 = vpop.f32.mrb[28].mxu1 }
 0xd9a   :  { %v4694_v59 = vadd.f32 %v3749_v58, %v3233_v57  ;;  %v1753_v37 = vpop.f32.mrb[29].mxu1 }
 0xd9b   :  { %v4696_v60 = vadd.f32 %v3233_v57, %v1753_v37  ;;  %v3750_v61 = vpop.f32.mrb[30].mxu1 }
 0xd9c   :  { %3098 = vst [vmem:[#allocation16 + $0x90] sm:$0xff] %v4694_v59  ;;  %v4699_v62 = vadd.f32 %v3750_v61, %v3233_v57  ;;  %v1756_v40 = vpop.f32.mrb[31].mxu1 }
 0xd9d   :  { %3096 = vst [vmem:[#allocation16 + $0x80] sm:$0xff] %v4696_v60  ;;  %v4702_v63 = vadd.f32 %v3233_v57, %v1756_v40 }
 0xd9e   :  { %3099 = vst [vmem:[#allocation16 + $0x98] sm:$0xff] %v4699_v62 }
 0xd9f   :  { %3097 = vst [vmem:[#allocation16 + $0x88] sm:$0xff] %v4702_v63 }
 0xdb9   :  { %v3769_v0 = vpop.f32.mrb[32].mxu1 }
 0xdba   :  { %v1867_v1 = vpop.f32.mrb[33].mxu1 }
 0xdbb   :  { %v3770_v2 = vpop.f32.mrb[34].mxu1 }
 0xdbc   :  { %v1883_v3 = vpack.c.bf16 %v3770_v2, %v3769_v0  ;;  %v1870_v4 = vpop.f32.mrb[35].mxu1 }
 0xdbd   :  { %v1882_v5 = vpack.c.bf16 %v1870_v4, %v1867_v1 }
 0xdbf   :  { %3771 = vmatprep.subr.bf16.mxu0 %v1882_v5 }
 0xdc0   :  { %3772 = vmatpush3.bf16.msra.mxu0 %v1882_v5 }
 0xdc1   :  { %3773 = vmatprep.subr.bf16.mxu0 %v1883_v3 }
 0xdc4   :  { %3774 = vmatpush3.bf16.msra.mxu0 %v1883_v3 }
 0xdc5   :  { %3779 = vmatprep.subr.bf16.mxu0 %v4042_v7 }
 0xdc7   :  { %3776 = vmatmul.mubr.msk.bf16.vlgmr.msra.gmra.mrb[24].mxu0 %vm288_vm0, %v4688_v47 }
 0xdc8   :  { %3780 = vmatpush3.bf16.msra.mxu0 %v4042_v7  ;;  %3795 = vmatprep.mubr.bf16.mxu0 %v4630_v10  ;;  %v4050_v10 = vld [vmem:[#allocation13 + $0x280] sm:$0xff]  }
 0xdc9   :  { %3781 = vmatprep.subr.bf16.mxu0 %v4043_v43 }
 0xdcc   :  { %3782 = vmatpush3.bf16.msra.mxu0 %v4043_v43 }
 0xdcd   :  { %3783 = vmatprep.subr.bf16.mxu0 %v4044_v8 }
 0xdd0   :  { %3784 = vmatpush3.bf16.msra.mxu0 %v4044_v8 }
 0xdd1   :  { %3785 = vmatprep.subr.bf16.mxu0 %v4045_v9 }
 0xdd4   :  { %3786 = vmatpush3.bf16.msra.mxu0 %v4045_v9 }
 0xdd5   :  { %3787 = vmatprep.subr.bf16.mxu0 %v4046_v11 }
 0xdd8   :  { %3788 = vmatpush3.bf16.msra.mxu0 %v4046_v11 }
 0xdd9   :  { %3789 = vmatprep.subr.bf16.mxu0 %v4047_v12 }
 0xddc   :  { %3790 = vmatpush3.bf16.msra.mxu0 %v4047_v12 }
 0xddd   :  { %3791 = vmatprep.subr.bf16.mxu0 %v4048_v15 }
 0xde0   :  { %3792 = vmatpush3.bf16.msra.mxu0 %v4048_v15 }
 0xde1   :  { %3793 = vmatprep.subr.bf16.mxu0 %v4049_v17 }
 0xde4   :  { %3794 = vmatpush3.bf16.msra.mxu0 %v4049_v17 }
 0xde5   :  { %3799 = vmatprep.subr.bf16.mxu0 %v4050_v10 }
 0xde7   :  { %3796 = vmatmul.mubr.bf16.vlgmr.msra.gmra.mrb[28].mxu0 %v4632_v16  ;;  %v4056_v16 = vld [vmem:[#allocation13 + $0x2b0] sm:$0xff]  }
 0xde8   :  { %3815 = vmatprep.mubr.bf16.mxu0 %v4590_v6  ;;  %3800 = vmatpush3.bf16.msra.mxu0 %v4050_v10  ;;  %v4057_v6 = vld [vmem:[#allocation13 + $0x2b8] sm:$0xff]  }
 0xde9   :  { %3801 = vmatprep.subr.bf16.mxu0 %v4051_v18 }
 0xdec   :  { %3802 = vmatpush3.bf16.msra.mxu0 %v4051_v18 }
 0xded   :  { %3803 = vmatprep.subr.bf16.mxu0 %v4052_v14 }
 0xdf0   :  { %3804 = vmatpush3.bf16.msra.mxu0 %v4052_v14 }
 0xdf1   :  { %3805 = vmatprep.subr.bf16.mxu0 %v4053_v50 }
 0xdf4   :  { %3806 = vmatpush3.bf16.msra.mxu0 %v4053_v50 }
 0xdf5   :  { %3807 = vmatprep.subr.bf16.mxu0 %v4054_v19 }
 0xdf8   :  { %3808 = vmatpush3.bf16.msra.mxu0 %v4054_v19 }
 0xdf9   :  { %3809 = vmatprep.subr.bf16.mxu0 %v4055_v20 }
 0xdfc   :  { %3810 = vmatpush3.bf16.msra.mxu0 %v4055_v20 }
 0xdfd   :  { %3811 = vmatprep.subr.bf16.mxu0 %v4056_v16 }
 0xe00   :  { %3812 = vmatpush3.bf16.msra.mxu0 %v4056_v16 }
 0xe01   :  { %3813 = vmatprep.subr.bf16.mxu0 %v4057_v6 }
 0xe04   :  { %3814 = vmatpush3.bf16.msra.mxu0 %v4057_v6 }
 0xe05   :  { %3819 = vmatprep.subr.bf16.mxu0 %v4058_v52 }
 0xe07   :  { %3816 = vmatmul.mubr.bf16.vlgmr.msra.gmra.mrb[28].mxu0 %v4593_v13  ;;  %v3244_v13 = vld [vmem:[#allocation14 + $0x7] ss:$0 sm:$0xff] }
 0xe08   :  { %3820 = vmatpush3.bf16.msra.mxu0 %v4058_v52 }
 0xe09   :  { %3821 = vmatprep.subr.bf16.mxu0 %v4059_v21 }
 0xe0c   :  { %3822 = vmatpush3.bf16.msra.mxu0 %v4059_v21 }
 0xe0d   :  { %3823 = vmatprep.subr.bf16.mxu0 %v4060_v22 }
 0xe10   :  { %3824 = vmatpush3.bf16.msra.mxu0 %v4060_v22 }
 0xe11   :  { %3825 = vmatprep.subr.bf16.mxu0 %v4061_v23 }
 0xe14   :  { %3826 = vmatpush3.bf16.msra.mxu0 %v4061_v23 }
 0xe15   :  { %3827 = vmatprep.subr.bf16.mxu0 %v4062_v54 }
 0xe18   :  { %3828 = vmatpush3.bf16.msra.mxu0 %v4062_v54 }
 0xe19   :  { %3829 = vmatprep.subr.bf16.mxu0 %v4063_v56 }
 0xe1c   :  { %3830 = vmatpush3.bf16.msra.mxu0 %v4063_v56 }
 0xe1d   :  { %3831 = vmatprep.subr.bf16.mxu0 %v4064_v24 }
 0xe20   :  { %3832 = vmatpush3.bf16.msra.mxu0 %v4064_v24 }
 0xe21   :  { %3833 = vmatprep.subr.bf16.mxu0 %v4065_v25 }
 0xe24   :  { %3834 = vmatpush3.bf16.msra.mxu0 %v4065_v25 }
 0xe9a   :  { %v3777_v26 = vpop.f32.mrb[24].mxu0 }
 0xe9b   :  { %v4712_v27 = vadd.f32 %v3777_v26, %v3244_v13  ;;  %v1923_v28 = vpop.f32.mrb[25].mxu0 }
 0xe9c   :  { %v4714_v29 = vadd.f32 %v3244_v13, %v1923_v28  ;;  %v3778_v30 = vpop.f32.mrb[26].mxu0 }
 0xe9d   :  { %v1952_v31 = vand.u32 2147483647, %v4712_v27  ;;  %v4717_v32 = vadd.f32 %v3778_v30, %v3244_v13  ;;  %v1926_v33 = vpop.f32.mrb[27].mxu0  ;;  %v1940_v12 = vmax.f32 %v4712_v27, 0.0  ;;  %vm1944_vm9 = vcmp.ne.f32.partialorder %v4712_v27, %v4712_v27 }
 0xe9e   :  { %v1950_v36 = vand.u32 2147483647, %v4714_v29  ;;  %v4720_v38 = vadd.f32 %v3244_v13, %v1926_v33  ;;  %v1938_v15 = vmax.f32 %v4714_v29, 0.0  ;;  %vm1942_vm10 = vcmp.ne.f32.partialorder %v4714_v29, %v4714_v29 }
 0xe9f   :  { %v1956_v39 = vsub.f32 0.0, %v1952_v31  ;;  %v1953_v41 = vand.u32 2147483647, %v4717_v32  ;;  %v1941_v24 = vmax.f32 %v4717_v32, 0.0  ;;  %vm1945_vm15 = vcmp.ne.f32.partialorder %v4717_v32, %v4717_v32 }
 0xea0   :  { %v1954_v42 = vsub.f32 0.0, %v1950_v36  ;;  %v1951_v44 = vand.u32 2147483647, %v4720_v38  ;;  %v1939_v33 = vmax.f32 %v4720_v38, 0.0  ;;  %vm1943_vm1 = vcmp.ne.f32.partialorder %v4720_v38, %v4720_v38 }
 0xea1   :  { %v1962_v45 = vmul.f32 1.442695, %v1956_v39  ;;  %v1957_v46 = vsub.f32 0.0, %v1953_v41 }
 0xea2   :  { %v1958_v48 = vmul.f32 1.442695, %v1954_v42  ;;  %v1955_v49 = vsub.f32 0.0, %v1951_v44 }
 0xea3   :  { %4130 = vpow2.f32 %v1962_v45  ;;  %v1964_v51 = vmul.f32 1.442695, %v1957_v46 }
 0xea4   :  { %4132 = vpow2.f32 %v1958_v48  ;;  %v1960_v53 = vmul.f32 1.442695, %v1955_v49 }
 0xea5   :  { %4134 = vpow2.f32 %v1964_v51 }
 0xea6   :  { %4136 = vpow2.f32 %v1960_v53 }
 0xead   :  { %v4131_v35 = vpop.eup %4130 }
 0xeae   :  { %v4133_v55 = vpop.eup %4132  ;;  %v1984_v57 = vadd.f32 1.0, %v4131_v35  ;;  %v1987_v1 = vmul.f32 -0.5, %v4131_v35  ;;  %v1990_v7 = vand.u32 2147483647, %v4131_v35 }
 0xeaf   :  { %v4135_v58 = vpop.eup %4134  ;;  %v1966_v37 = vadd.f32 1.0, %v4133_v55  ;;  %v1969_v2 = vmul.f32 -0.5, %v4133_v55  ;;  %v1972_v8 = vand.u32 2147483647, %v4133_v55 }
 0xeb0   :  { %v4137_v61 = vpop.eup %4136  ;;  %4138 = vlog2.f32 %v1984_v57  ;;  %v1993_v40 = vadd.f32 1.0, %v4135_v58  ;;  %v1996_v3 = vmul.f32 -0.5, %v4135_v58  ;;  %v1988_v4 = vadd.f32 1.0, %v1987_v1  ;;  %v985_v57 = vld [vmem:[#allocation10 + $0x18] sm:$0xff] }
 0xeb1   :  { %4140 = vlog2.f32 %v1966_v37  ;;  %v1975_v0 = vadd.f32 1.0, %v4137_v61  ;;  %v1978_v5 = vmul.f32 -0.5, %v4137_v61  ;;  %v1970_v43 = vadd.f32 1.0, %v1969_v2 }
 0xeb2   :  { %4142 = vlog2.f32 %v1993_v40  ;;  %v1997_v9 = vadd.f32 1.0, %v1996_v3  ;;  %v1999_v17 = vand.u32 2147483647, %v4135_v58  ;;  %v1989_v14 = vmul.f32 %v4131_v35, %v1988_v4  ;;  %v984_v35 = vld [vmem:[#allocation10 + $0x10] sm:$0xff]  ;;  %v983_v40 = vld [vmem:[#allocation10 + $0x8] sm:$0xff] }
 0xeb3   :  { %4144 = vlog2.f32 %v1975_v0  ;;  %v1979_v50 = vadd.f32 1.0, %v1978_v5  ;;  %vm1991_vm11 = vcmp.lt.f32.partialorder %v1990_v7, 0.0004427343  ;;  %v1971_v16 = vmul.f32 %v4133_v55, %v1970_v43 }
 0xeb4   :  { %v1981_v6 = vand.u32 2147483647, %v4137_v61  ;;  %vm1973_vm12 = vcmp.lt.f32.partialorder %v1972_v8, 0.0004427343  ;;  %v1998_v22 = vmul.f32 %v4135_v58, %v1997_v9  ;;  %vm2000_vm13 = vcmp.lt.f32.partialorder %v1999_v17, 0.0004427343 }
 0xeb5   :  { %v1980_v28 = vmul.f32 %v4137_v61, %v1979_v50  ;;  %v4068_v17 = vld [vmem:[#allocation13 + $0x350] sm:$0xff]  }
 0xeb6   :  { %vm1982_vm14 = vcmp.lt.f32.partialorder %v1981_v6, 0.0004427343 }
 0xeba   :  { %v4139_v11 = vpop.eup %4138 }
 0xebb   :  { %v4141_v10 = vpop.eup %4140  ;;  %v1986_v18 = vmul.f32 0.6931472, %v4139_v11 }
 0xebc   :  { %v4143_v19 = vpop.eup %4142  ;;  %v1968_v20 = vmul.f32 0.6931472, %v4141_v10  ;;  %v3271_v10 = vld [vmem:[#allocation14 + $0x8] ss:$0 sm:$0xff] }
 0xebd   :  { %v1992_v52 = vsel %vm1991_vm11, %v1989_v14, %v1986_v18  ;;  %v1995_v21 = vmul.f32 0.6931472, %v4143_v19  ;;  %v4145_v23 = vpop.eup %4144 }
 0xebe   :  { %v2004_v54 = vadd.f32 %v1992_v52, %v1940_v12  ;;  %v1974_v56 = vsel %vm1973_vm12, %v1971_v16, %v1968_v20  ;;  %v1977_v26 = vmul.f32 0.6931472, %v4145_v23 }
 0xebf   :  { %v2002_v25 = vadd.f32 %v1974_v56, %v1938_v15  ;;  %v2001_v13 = vsel %vm2000_vm13, %v1998_v22, %v1995_v21 }
 0xec0   :  { %v2008_v30 = vsel %vm1944_vm9, %v4712_v27, %v2004_v54  ;;  %v2005_v31 = vadd.f32 %v2001_v13, %v1941_v24  ;;  %v1983_v41 = vsel %vm1982_vm14, %v1980_v28, %v1977_v26  ;;  %v4069_v26 = vld [vmem:[#allocation13 + $0x358] sm:$0xff]   ;;  %v4070_v28 = vld [vmem:[#allocation13 + $0x360] sm:$0xff]  }
 0xec1   :  { %v2012_v36 = vmul.f32 0.5, %v2008_v30  ;;  %3103 = vst [vmem:[#allocation16 + $0xb0] sm:$0xff] %v2008_v30  ;;  %v2006_v39 = vsel %vm1942_vm10, %v4714_v29, %v2002_v25  ;;  %v2003_v27 = vadd.f32 %v1983_v41, %v1939_v33  ;;  %v4071_v30 = vld [vmem:[#allocation13 + $0x368] sm:$0xff]   ;;  %v4073_v33 = vld [vmem:[#allocation13 + $0x378] sm:$0xff]  }
 0xec2   :  { %v2010_v42 = vmul.f32 0.5, %v2006_v39  ;;  %3101 = vst [vmem:[#allocation16 + $0xa0] sm:$0xff] %v2006_v39  ;;  %v2009_v44 = vsel %vm1945_vm15, %v4717_v32, %v2005_v31  ;;  %v982_v32 = vld [vmem:[#allocation10] sm:$0xff]  ;;  %v4072_v31 = vld [vmem:[#allocation13 + $0x370] sm:$0xff]  }
 0xec3   :  { %v2018_v45 = vmul.f32 1.442695, %v2012_v36  ;;  %v2013_v46 = vmul.f32 0.5, %v2009_v44  ;;  %3104 = vst [vmem:[#allocation16 + $0xb8] sm:$0xff] %v2009_v44  ;;  %v2007_v49 = vsel %vm1943_vm1, %v4720_v38, %v2003_v27 }
 0xec4   :  { %v2014_v48 = vmul.f32 1.442695, %v2010_v42  ;;  %v2011_v51 = vmul.f32 0.5, %v2007_v49  ;;  %3102 = vst [vmem:[#allocation16 + $0xa8] sm:$0xff] %v2007_v49 }
 0xec5   :  { %4146 = vpow2.f32 %v2018_v45  ;;  %v2020_v29 = vmul.f32 1.442695, %v2013_v46 }
 0xec6   :  { %4148 = vpow2.f32 %v2014_v48  ;;  %v2016_v53 = vmul.f32 1.442695, %v2011_v51 }
 0xec7   :  { %4150 = vpow2.f32 %v2020_v29 }
 0xec8   :  { %4152 = vpow2.f32 %v2016_v53 }
 0xecf   :  { %v4147_v55 = vpop.eup %4146 }
 0xed0   :  { %v4149_v58 = vpop.eup %4148  ;;  %v2024_v37 = vmul.f32 %v4147_v55, %v984_v35 }
 0xed1   :  { %v4151_v61 = vpop.eup %4150  ;;  %v2022_v0 = vmul.f32 %v4149_v58, %v982_v32 }
 0xed2   :  { %v2025_v1 = vmul.f32 %v4151_v61, %v985_v57  ;;  %v2028_v38 = vadd.f32 %v2024_v37, %v4694_v59  ;;  %v4153_v2 = vpop.eup %4152 }
 0xed3   :  { %v2026_v3 = vadd.f32 %v2022_v0, %v4696_v60  ;;  %v2023_v4 = vmul.f32 %v4153_v2, %v983_v40  ;;  %v4074_v2 = vld [vmem:[#allocation13 + $0x380] sm:$0xff]  }
 0xed4   :  { %v2029_v5 = vadd.f32 %v2025_v1, %v4699_v62  ;;  %3093 = vst [vmem:[#allocation16 + $0x70] sm:$0xff] %v2028_v38  ;;  %v4066_v62 = vld [vmem:[#allocation13 + $0x340] sm:$0xff]  }
 0xed5   :  { %3091 = vst [vmem:[#allocation16 + $0x60] sm:$0xff] %v2026_v3  ;;  %v2027_v7 = vadd.f32 %v2023_v4, %v4702_v63  ;;  %v4067_v63 = vld [vmem:[#allocation13 + $0x348] sm:$0xff]   ;;  %v4076_v4 = vld [vmem:[#allocation13 + $0x390] sm:$0xff]  }
 0xed6   :  { %v2263_v43 = vpack.c.bf16 %v2029_v5, %v2028_v38  ;;  %3094 = vst [vmem:[#allocation16 + $0x78] sm:$0xff] %v2029_v5  ;;  %v4077_v5 = vld [vmem:[#allocation13 + $0x398] sm:$0xff]  }
 0xed7   :  { %v2262_v8 = vpack.c.bf16 %v2027_v7, %v2026_v3  ;;  %3092 = vst [vmem:[#allocation16 + $0x68] sm:$0xff] %v2027_v7  ;;  %v4075_v3 = vld [vmem:[#allocation13 + $0x388] sm:$0xff]   ;;  %v4078_v7 = vld [vmem:[#allocation13 + $0x3a0] sm:$0xff]  }
 0xed9   :  { %3835 = vmatprep.mubr.bf16.mxu0 %v2262_v8  ;;  %v4080_v8 = vld [vmem:[#allocation13 + $0x3b0] sm:$0xff]  }
 0xeda   :  { %3836 = vmatmul.mubr.bf16.vlgmr.msra.gmra.mrb[28].mxu0 %v2263_v43  ;;  %v4079_v43 = vld [vmem:[#allocation13 + $0x3a8] sm:$0xff]  }
 0xedb   :  { %3899 = vmatprep.mubr.msk.bf16.mxu0 %vm288_vm0, %v4684_v34 }
 0xfad   :  { %v3837_v59 = vpop.f32.mrb[28].mxu0 }
 0xfae   :  { %v2363_v9 = vpop.f32.mrb[29].mxu0 }
 0xfaf   :  { %v3838_v11 = vpop.f32.mrb[30].mxu0 }
 0xfb0   :  { %v2383_v60 = vpack.c.bf16 %v3838_v11, %v3837_v59  ;;  %v2366_v12 = vpop.f32.mrb[31].mxu0  ;;  %v4081_v59 = vld [vmem:[#allocation13 + $0x3b8] sm:$0xff]   ;;  %v3282_v11 = vld [vmem:[#allocation14 + $0x9] ss:$0 sm:$0xff] }
 0xfb1   :  { %v2382_v15 = vpack.c.bf16 %v2366_v12, %v2363_v9  ;;  %v4082_v9 = vld [vmem:[#allocation13 + $0x3c0] sm:$0xff]  }
 0xfb3   :  { %3839 = vmatprep.subr.bf16.mxu1 %v2382_v15 }
 0xfb4   :  { %3840 = vmatpush3.bf16.msra.mxu1 %v2382_v15 }
 0xfb5   :  { %3841 = vmatprep.subr.bf16.mxu1 %v2383_v60 }
 0xfb8   :  { %3842 = vmatpush3.bf16.msra.mxu1 %v2383_v60 }
 0xfb9   :  { %3847 = vmatprep.subr.bf16.mxu1 %v4066_v62 }
 0xfbb   :  { %3844 = vmatmul.mubr.msk.bf16.vlgmr.msra.gmra.mrb[36].mxu1 %vm288_vm0, %v4688_v47 }
 0xfbc   :  { %3848 = vmatpush3.bf16.msra.mxu1 %v4066_v62 }
 0xfbd   :  { %3849 = vmatprep.subr.bf16.mxu1 %v4067_v63 }
 0xfc0   :  { %3850 = vmatpush3.bf16.msra.mxu1 %v4067_v63 }
 0xfc1   :  { %3851 = vmatprep.subr.bf16.mxu1 %v4068_v17 }
 0xfc4   :  { %3852 = vmatpush3.bf16.msra.mxu1 %v4068_v17 }
 0xfc5   :  { %3853 = vmatprep.subr.bf16.mxu1 %v4069_v26 }
 0xfc8   :  { %3854 = vmatpush3.bf16.msra.mxu1 %v4069_v26 }
 0xfc9   :  { %3855 = vmatprep.subr.bf16.mxu1 %v4070_v28 }
 0xfcc   :  { %3856 = vmatpush3.bf16.msra.mxu1 %v4070_v28 }
 0xfcd   :  { %3857 = vmatprep.subr.bf16.mxu1 %v4071_v30 }
 0xfd0   :  { %3858 = vmatpush3.bf16.msra.mxu1 %v4071_v30 }
 0xfd1   :  { %3859 = vmatprep.subr.bf16.mxu1 %v4072_v31 }
 0xfd4   :  { %3860 = vmatpush3.bf16.msra.mxu1 %v4072_v31 }
 0xfd5   :  { %3861 = vmatprep.subr.bf16.mxu1 %v4073_v33 }
 0xfd8   :  { %3862 = vmatpush3.bf16.msra.mxu1 %v4073_v33 }
0x108e   :  { %v3845_v18 = vpop.f32.mrb[36].mxu1 }
0x108f   :  { %v2423_v14 = vpop.f32.mrb[37].mxu1  ;;  %v2432_v50 = vadd.f32 %v3845_v18, %v3271_v10 }
0x1090   :  { %v2424_v19 = vadd.f32 %v3271_v10, %v2423_v14  ;;  %v3846_v20 = vpop.f32.mrb[38].mxu1 }
0x1091   :  { %v2426_v16 = vpop.f32.mrb[39].mxu1  ;;  %v2435_v52 = vadd.f32 %v3846_v20, %v3271_v10  ;;  %v2440_v22 = vmax.f32 %v2432_v50, 0.0 }
0x1092   :  { %v2438_v6 = vmax.f32 %v2424_v19, 0.0  ;;  %v2427_v21 = vadd.f32 %v3271_v10, %v2426_v16 }
0x1093   :  { %v2441_v56 = vmax.f32 %v2435_v52, 0.0  ;;  %v2444_v25 = vmul.f32 %v2440_v22, %v2440_v22  ;;  %v4083_v52 = vld [vmem:[#allocation13 + $0x3c8] sm:$0xff]  }
0x1094   :  { %v2439_v23 = vmax.f32 %v2427_v21, 0.0  ;;  %v2442_v54 = vmul.f32 %v2438_v6, %v2438_v6  ;;  %v4084_v21 = vld [vmem:[#allocation13 + $0x3d0] sm:$0xff]  }
0x1095   :  { %v2445_v13 = vmul.f32 %v2441_v56, %v2441_v56 }
0x1096   :  { %2446 = vadd.xlane.f32.xlu0 %v2442_v54  ;;  %v2443_v24 = vmul.f32 %v2439_v23, %v2439_v23  ;;  %v4087_v54 = vld [vmem:[#allocation13 + $0x3e8] sm:$0xff]  }
0x1098   :  { %2448 = vadd.xlane.f32.xlu1 %v2443_v24  ;;  %v4089_v24 = vld [vmem:[#allocation13 + $0x3f8] sm:$0xff]  }
0x109a   :  { %2450 = vadd.xlane.f32.xlu0 %v2444_v25 }
0x109c   :  { %2452 = vadd.xlane.f32.xlu1 %v2445_v13 }
0x1123   :  { %v2447_v36 = vpop.xlane.xlu0 %2446 }
0x1124   :  { %v2454_v39 = vmax.f32 %v2447_v36, 1e-24 }
0x1125   :  { %v2449_v41 = vpop.xlane.xlu1 %2448 }
0x1126   :  { %4154 = vrsqrt.f32 %v2454_v39  ;;  %v2455_v42 = vmax.f32 %v2449_v41, 1e-24 }
0x1127   :  { %v2451_v44 = vpop.xlane.xlu0 %2450 }
0x1128   :  { %4156 = vrsqrt.f32 %v2455_v42  ;;  %v2456_v27 = vmax.f32 %v2451_v44, 1e-24 }
0x1129   :  { %v2453_v45 = vpop.xlane.xlu1 %2452 }
0x112a   :  { %4158 = vrsqrt.f32 %v2456_v27  ;;  %v2457_v46 = vmax.f32 %v2453_v45, 1e-24  ;;  %v3293_v27 = vld [vmem:[#allocation14 + $0xa] ss:$0 sm:$0xff] }
0x112c   :  { %4160 = vrsqrt.f32 %v2457_v46 }
0x1130   :  { %v4155_v48 = vpop.eup %4154 }
0x1131   :  { %v2462_v29 = vmul.f32 %v4155_v48, %v2438_v6 }
0x1132   :  { %v4157_v49 = vpop.eup %4156 }
0x1133   :  { %v2463_v51 = vmul.f32 %v4157_v49, %v2439_v23  ;;  %v4086_v23 = vld [vmem:[#allocation13 + $0x3e0] sm:$0xff]  }
0x1134   :  { %v4159_v53 = vpop.eup %4158 }
0x1135   :  { %v2466_v35 = vpack.c.bf16 %v2463_v51, %v2462_v29  ;;  %v2464_v55 = vmul.f32 %v4159_v53, %v2440_v22  ;;  %v4085_v22 = vld [vmem:[#allocation13 + $0x3d8] sm:$0xff]  }
0x1136   :  { %v4161_v32 = vpop.eup %4160 }
0x1137   :  { %3863 = vmatprep.mubr.bf16.mxu1 %v2466_v35  ;;  %v2465_v57 = vmul.f32 %v4161_v32, %v2441_v56  ;;  %v4088_v56 = vld [vmem:[#allocation13 + $0x3f0] sm:$0xff]  }
0x1139   :  { %v2467_v58 = vpack.c.bf16 %v2465_v57, %v2464_v55 }
0x113b   :  { %3864 = vmatmul.mubr.bf16.vlgmr.msra.gmra.mrb[40].mxu1 %v2467_v58 }
0x113c   :  { %3871 = vmatprep.mubr.msk.bf16.mxu1 %vm288_vm0, %v4684_v34 }
0x120e   :  { %v3865_v37 = vpop.f32.mrb[40].mxu1 }
0x120f   :  { %v2567_v61 = vpop.f32.mrb[41].mxu1 }
0x1210   :  { %v3866_v40 = vpop.f32.mrb[42].mxu1 }
0x1211   :  { %v2583_v0 = vpack.c.bf16 %v3866_v40, %v3865_v37  ;;  %v2570_v1 = vpop.f32.mrb[43].mxu1 }
0x1212   :  { %v2582_v38 = vpack.c.bf16 %v2570_v1, %v2567_v61 }
0x1214   :  { %3867 = vmatprep.subr.bf16.mxu1 %v2582_v38 }
0x1215   :  { %3868 = vmatpush3.bf16.msra.mxu1 %v2582_v38 }
0x1216   :  { %3869 = vmatprep.subr.bf16.mxu1 %v2583_v0 }
0x1219   :  { %3870 = vmatpush3.bf16.msra.mxu1 %v2583_v0 }
0x121a   :  { %3875 = vmatprep.subr.bf16.mxu1 %v4074_v2 }
0x121c   :  { %3872 = vmatmul.mubr.msk.bf16.vlgmr.msra.gmra.mrb[44].mxu1 %vm288_vm0, %v4688_v47 }
0x121d   :  { %3876 = vmatpush3.bf16.msra.mxu1 %v4074_v2 }
0x121e   :  { %3877 = vmatprep.subr.bf16.mxu1 %v4075_v3 }
0x1221   :  { %3878 = vmatpush3.bf16.msra.mxu1 %v4075_v3 }
0x1222   :  { %3879 = vmatprep.subr.bf16.mxu1 %v4076_v4 }
0x1225   :  { %3880 = vmatpush3.bf16.msra.mxu1 %v4076_v4 }
0x1226   :  { %3881 = vmatprep.subr.bf16.mxu1 %v4077_v5 }
0x1229   :  { %3882 = vmatpush3.bf16.msra.mxu1 %v4077_v5 }
0x122a   :  { %3883 = vmatprep.subr.bf16.mxu1 %v4078_v7 }
0x122d   :  { %3884 = vmatpush3.bf16.msra.mxu1 %v4078_v7 }
0x122e   :  { %3885 = vmatprep.subr.bf16.mxu1 %v4079_v43 }
0x1231   :  { %3886 = vmatpush3.bf16.msra.mxu1 %v4079_v43 }
0x1232   :  { %3887 = vmatprep.subr.bf16.mxu1 %v4080_v8 }
0x1235   :  { %3888 = vmatpush3.bf16.msra.mxu1 %v4080_v8 }
0x1236   :  { %3889 = vmatprep.subr.bf16.mxu1 %v4081_v59 }
0x1239   :  { %3890 = vmatpush3.bf16.msra.mxu1 %v4081_v59 }
0x123a   :  { %3903 = vmatprep.subr.bf16.mxu1 %v4082_v9 }
0x12ef   :  { %v3873_v60 = vpop.f32.mrb[44].mxu1 }
0x12f0   :  { %v2632_v12 = vadd.f32 %v3873_v60, %v3282_v11  ;;  %v2623_v15 = vpop.f32.mrb[45].mxu1 }
0x12f1   :  { %v2624_v62 = vadd.f32 %v3282_v11, %v2623_v15  ;;  %v3874_v63 = vpop.f32.mrb[46].mxu1 }
0x12f2   :  { %v2635_v17 = vadd.f32 %v3874_v63, %v3282_v11  ;;  %v2626_v10 = vpop.f32.mrb[47].mxu1  ;;  %v2640_v14 = vmax.f32 %v2632_v12, 0.0 }
0x12f3   :  { %v2627_v18 = vadd.f32 %v3282_v11, %v2626_v10  ;;  %v2638_v19 = vmax.f32 %v2624_v62, 0.0 }
0x12f4   :  { %v2641_v50 = vmax.f32 %v2635_v17, 0.0 }
0x12f5   :  { %v2639_v20 = vmax.f32 %v2627_v18, 0.0 }
0x12f6   :  { %v2643_v16 = vpack.c.bf16 %v2641_v50, %v2640_v14 }
0x12f7   :  { %v2642_v6 = vpack.c.bf16 %v2639_v20, %v2638_v19 }
0x12f9   :  { %3891 = vmatprep.mubr.bf16.mxu1 %v2642_v6 }
0x12fa   :  { %3892 = vmatmul.mubr.bf16.vlgmr.msra.gmra.mrb[48].mxu1 %v2643_v16 }
0x12fb   :  { %3904 = vmatpush3.bf16.msra.mxu1 %v4082_v9  ;;  %3919 = vmatprep.mubr.bf16.mxu1 %v2642_v6 }
0x12fc   :  { %3905 = vmatprep.subr.bf16.mxu1 %v4083_v52 }
0x12ff   :  { %3906 = vmatpush3.bf16.msra.mxu1 %v4083_v52 }
0x1300   :  { %3907 = vmatprep.subr.bf16.mxu1 %v4084_v21 }
0x1303   :  { %3908 = vmatpush3.bf16.msra.mxu1 %v4084_v21 }
0x1304   :  { %3909 = vmatprep.subr.bf16.mxu1 %v4085_v22 }
0x1307   :  { %3910 = vmatpush3.bf16.msra.mxu1 %v4085_v22 }
0x1308   :  { %3911 = vmatprep.subr.bf16.mxu1 %v4086_v23 }
0x130b   :  { %3912 = vmatpush3.bf16.msra.mxu1 %v4086_v23 }
0x130c   :  { %3913 = vmatprep.subr.bf16.mxu1 %v4087_v54 }
0x130f   :  { %3914 = vmatpush3.bf16.msra.mxu1 %v4087_v54 }
0x1310   :  { %3915 = vmatprep.subr.bf16.mxu1 %v4088_v56 }
0x1313   :  { %3916 = vmatpush3.bf16.msra.mxu1 %v4088_v56 }
0x1314   :  { %3917 = vmatprep.subr.bf16.mxu1 %v4089_v24 }
0x1317   :  { %3918 = vmatpush3.bf16.msra.mxu1 %v4089_v24 }
0x131a   :  { %3920 = vmatmul.mubr.bf16.vlgmr.msra.gmra.mrb[52].mxu1 %v2643_v16 }
0x13cd   :  { %v3893_v25 = vpop.f32.mrb[48].mxu1 }
0x13ce   :  { %v2743_v13 = vpop.f32.mrb[49].mxu1 }
0x13cf   :  { %v3894_v26 = vpop.f32.mrb[50].mxu1 }
0x13d0   :  { %v2759_v28 = vpack.c.bf16 %v3894_v26, %v3893_v25  ;;  %v2746_v30 = vpop.f32.mrb[51].mxu1 }
0x13d1   :  { %v2758_v31 = vpack.c.bf16 %v2746_v30, %v2743_v13 }
0x13d3   :  { %3895 = vmatprep.subr.bf16.mxu0 %v2758_v31 }
0x13d4   :  { %3896 = vmatpush3.bf16.msra.mxu0 %v2758_v31 }
0x13d5   :  { %3897 = vmatprep.subr.bf16.mxu0 %v2759_v28 }
0x13d8   :  { %3898 = vmatpush3.bf16.msra.mxu0 %v2759_v28 }
0x13db   :  { %3900 = vmatmul.mubr.msk.bf16.vlgmr.msra.gmra.mrb[32].mxu0 %vm288_vm0, %v4688_v47 }
0x13dc   :  { %3927 = vmatprep.mubr.msk.bf16.mxu0 %vm288_vm0, %v4684_v34 }
0x13ed   :  { %v3921_v33 = vpop.f32.mrb[52].mxu1 }
0x13ee   :  { %v2913_v36 = vpop.f32.mrb[53].mxu1 }
0x13ef   :  { %v3922_v39 = vpop.f32.mrb[54].mxu1 }
0x13f0   :  { %v2929_v41 = vpack.c.bf16 %v3922_v39, %v3921_v33  ;;  %v2916_v42 = vpop.f32.mrb[55].mxu1 }
0x13f1   :  { %v2928_v44 = vpack.c.bf16 %v2916_v42, %v2913_v36 }
0x13f3   :  { %3923 = vmatprep.subr.bf16.mxu0 %v2928_v44 }
0x13f4   :  { %3924 = vmatpush3.bf16.msra.mxu0 %v2928_v44 }
0x13f5   :  { %3925 = vmatprep.subr.bf16.mxu0 %v2929_v41 }
0x13f8   :  { %3926 = vmatpush3.bf16.msra.mxu0 %v2929_v41 }
0x13fb   :  { %3928 = vmatmul.mubr.msk.bf16.vlgmr.msra.gmra.mrb[36].mxu0 %vm288_vm0, %v4688_v47  ;;  %v3304_v47 = vld [vmem:[#allocation14 + $0xb] ss:$0 sm:$0xff] }
0x14ae   :  { %v3901_v45 = vpop.f32.mrb[32].mxu0 }
0x14af   :  { %v4764_v46 = vadd.f32 %v3901_v45, %v3293_v27  ;;  %v2799_v48 = vpop.f32.mrb[33].mxu0 }
0x14b0   :  { %v4766_v49 = vadd.f32 %v3293_v27, %v2799_v48  ;;  %v3902_v34 = vpop.f32.mrb[34].mxu0 }
0x14b1   :  { %3113 = vst [vmem:[#allocation16 + $0xf0] sm:$0xff] %v4764_v46  ;;  %v4769_v29 = vadd.f32 %v3902_v34, %v3293_v27  ;;  %v2802_v51 = vpop.f32.mrb[35].mxu0 }
0x14b2   :  { %3111 = vst [vmem:[#allocation16 + $0xe0] sm:$0xff] %v4766_v49  ;;  %v4772_v53 = vadd.f32 %v3293_v27, %v2802_v51 }
0x14b3   :  { %3114 = vst [vmem:[#allocation16 + $0xf8] sm:$0xff] %v4769_v29 }
0x14b4   :  { %3112 = vst [vmem:[#allocation16 + $0xe8] sm:$0xff] %v4772_v53 }
0x14ce   :  { %v3929_v35 = vpop.f32.mrb[36].mxu0 }
0x14cf   :  { %v4776_v32 = vadd.f32 %v3929_v35, %v3304_v47  ;;  %v2969_v55 = vpop.f32.mrb[37].mxu0 }
0x14d0   :  { %v4778_v57 = vadd.f32 %v3304_v47, %v2969_v55  ;;  %v3930_v58 = vpop.f32.mrb[38].mxu0 }
0x14d1   :  { %v2998_v37 = vand.u32 2147483647, %v4776_v32  ;;  %v4781_v61 = vadd.f32 %v3930_v58, %v3304_v47  ;;  %v2972_v40 = vpop.f32.mrb[39].mxu0  ;;  %v2986_v23 = vmax.f32 %v4776_v32, 0.0  ;;  %vm2990_vm0 = vcmp.ne.f32.partialorder %v4776_v32, %v4776_v32 }
0x14d2   :  { %v2996_v0 = vand.u32 2147483647, %v4778_v57  ;;  %v4784_v1 = vadd.f32 %v3304_v47, %v2972_v40  ;;  %v2984_v54 = vmax.f32 %v4778_v57, 0.0  ;;  %vm2988_vm2 = vcmp.ne.f32.partialorder %v4778_v57, %v4778_v57 }
0x14d3   :  { %v3002_v38 = vsub.f32 0.0, %v2998_v37  ;;  %v2999_v2 = vand.u32 2147483647, %v4781_v61  ;;  %v2987_v45 = vmax.f32 %v4781_v61, 0.0  ;;  %vm2991_vm7 = vcmp.ne.f32.partialorder %v4781_v61, %v4781_v61 }
0x14d4   :  { %v3000_v3 = vsub.f32 0.0, %v2996_v0  ;;  %v2997_v4 = vand.u32 2147483647, %v4784_v1  ;;  %v2985_v58 = vmax.f32 %v4784_v1, 0.0  ;;  %vm2989_vm8 = vcmp.ne.f32.partialorder %v4784_v1, %v4784_v1 }
0x14d5   :  { %v3008_v5 = vmul.f32 1.442695, %v3002_v38  ;;  %v3003_v7 = vsub.f32 0.0, %v2999_v2 }
0x14d6   :  { %v3004_v43 = vmul.f32 1.442695, %v3000_v3  ;;  %v3001_v8 = vsub.f32 0.0, %v2997_v4 }
0x14d7   :  { %4162 = vpow2.f32 %v3008_v5  ;;  %v3010_v59 = vmul.f32 1.442695, %v3003_v7 }
0x14d8   :  { %4164 = vpow2.f32 %v3004_v43  ;;  %v3006_v9 = vmul.f32 1.442695, %v3001_v8 }
0x14d9   :  { %4166 = vpow2.f32 %v3010_v59  ;;  %v2032_v59 = vld [vmem:[#allocation11 + $0x10] sm:$0xff] }
0x14da   :  { %4168 = vpow2.f32 %v3006_v9 }
0x14e1   :  { %v4163_v11 = vpop.eup %4162 }
0x14e2   :  { %v4165_v60 = vpop.eup %4164  ;;  %v3030_v12 = vadd.f32 1.0, %v4163_v11  ;;  %v3033_v18 = vmul.f32 -0.5, %v4163_v11  ;;  %v3036_v16 = vand.u32 2147483647, %v4163_v11 }
0x14e3   :  { %v4167_v15 = vpop.eup %4166  ;;  %v3012_v62 = vadd.f32 1.0, %v4165_v60  ;;  %v3015_v14 = vmul.f32 -0.5, %v4165_v60  ;;  %v3018_v52 = vand.u32 2147483647, %v4165_v60 }
0x14e4   :  { %v4169_v63 = vpop.eup %4168  ;;  %4170 = vlog2.f32 %v3030_v12  ;;  %v3039_v17 = vadd.f32 1.0, %v4167_v15  ;;  %v3042_v50 = vmul.f32 -0.5, %v4167_v15  ;;  %v3034_v19 = vadd.f32 1.0, %v3033_v18 }
0x14e5   :  { %4172 = vlog2.f32 %v3012_v62  ;;  %v3021_v10 = vadd.f32 1.0, %v4169_v63  ;;  %v3024_v20 = vmul.f32 -0.5, %v4169_v63  ;;  %v3016_v6 = vadd.f32 1.0, %v3015_v14 }
0x14e6   :  { %4174 = vlog2.f32 %v3039_v17  ;;  %v3043_v21 = vadd.f32 1.0, %v3042_v50  ;;  %v3045_v56 = vand.u32 2147483647, %v4167_v15  ;;  %v3035_v13 = vmul.f32 %v4163_v11, %v3034_v19  ;;  %v2033_v11 = vld [vmem:[#allocation11 + $0x18] sm:$0xff] }
0x14e7   :  { %4176 = vlog2.f32 %v3021_v10  ;;  %v3025_v26 = vadd.f32 1.0, %v3024_v20  ;;  %vm3037_vm3 = vcmp.lt.f32.partialorder %v3036_v16, 0.0004427343  ;;  %v3017_v31 = vmul.f32 %v4165_v60, %v3016_v6 }
0x14e8   :  { %v3027_v33 = vand.u32 2147483647, %v4169_v63  ;;  %vm3019_vm4 = vcmp.lt.f32.partialorder %v3018_v52, 0.0004427343  ;;  %v3044_v41 = vmul.f32 %v4167_v15, %v3043_v21  ;;  %vm3046_vm5 = vcmp.lt.f32.partialorder %v3045_v56, 0.0004427343 }
0x14e9   :  { %v3026_v47 = vmul.f32 %v4169_v63, %v3025_v26  ;;  %v2031_v63 = vld [vmem:[#allocation11 + $0x8] sm:$0xff] }
0x14ea   :  { %vm3028_vm6 = vcmp.lt.f32.partialorder %v3027_v33, 0.0004427343 }
0x14ee   :  { %v4171_v22 = vpop.eup %4170 }
0x14ef   :  { %v4173_v24 = vpop.eup %4172  ;;  %v3032_v25 = vmul.f32 0.6931472, %v4171_v22 }
0x14f0   :  { %v4175_v28 = vpop.eup %4174  ;;  %v3014_v30 = vmul.f32 0.6931472, %v4173_v24 }
0x14f1   :  { %v3038_v36 = vsel %vm3037_vm3, %v3035_v13, %v3032_v25  ;;  %v3041_v39 = vmul.f32 0.6931472, %v4175_v28  ;;  %v4177_v42 = vpop.eup %4176 }
0x14f2   :  { %v3050_v44 = vadd.f32 %v3038_v36, %v2986_v23  ;;  %v3020_v27 = vsel %vm3019_vm4, %v3017_v31, %v3014_v30  ;;  %v3023_v51 = vmul.f32 0.6931472, %v4177_v42 }
0x14f3   :  { %v3048_v48 = vadd.f32 %v3020_v27, %v2984_v54  ;;  %v3047_v34 = vsel %vm3046_vm5, %v3044_v41, %v3041_v39 }
0x14f4   :  { %v3054_v35 = vsel %vm2990_vm0, %v4776_v32, %v3050_v44  ;;  %v3051_v55 = vadd.f32 %v3047_v34, %v2987_v45  ;;  %v3029_v0 = vsel %vm3028_vm6, %v3026_v47, %v3023_v51 }
0x14f5   :  { %v3058_v37 = vmul.f32 0.5, %v3054_v35  ;;  %3118 = vst [vmem:[#allocation16 + $0x110] sm:$0xff] %v3054_v35  ;;  %v3052_v40 = vsel %vm2988_vm2, %v4778_v57, %v3048_v48  ;;  %v3049_v32 = vadd.f32 %v3029_v0, %v2985_v58 }
0x14f6   :  { %v3056_v38 = vmul.f32 0.5, %v3052_v40  ;;  %3116 = vst [vmem:[#allocation16 + $0x100] sm:$0xff] %v3052_v40  ;;  %v3055_v2 = vsel %vm2991_vm7, %v4781_v61, %v3051_v55  ;;  %v2030_v61 = vld [vmem:[#allocation11] sm:$0xff] }
0x14f7   :  { %v3064_v3 = vmul.f32 1.442695, %v3058_v37  ;;  %v3059_v4 = vmul.f32 0.5, %v3055_v2  ;;  %3119 = vst [vmem:[#allocation16 + $0x118] sm:$0xff] %v3055_v2  ;;  %v3053_v7 = vsel %vm2989_vm8, %v4784_v1, %v3049_v32 }
0x14f8   :  { %v3060_v5 = vmul.f32 1.442695, %v3056_v38  ;;  %v3057_v43 = vmul.f32 0.5, %v3053_v7  ;;  %3117 = vst [vmem:[#allocation16 + $0x108] sm:$0xff] %v3053_v7 }
0x14f9   :  { %4178 = vpow2.f32 %v3064_v3  ;;  %v3066_v57 = vmul.f32 1.442695, %v3059_v4 }
0x14fa   :  { %4180 = vpow2.f32 %v3060_v5  ;;  %v3062_v8 = vmul.f32 1.442695, %v3057_v43 }
0x14fb   :  { %4182 = vpow2.f32 %v3066_v57 }
0x14fc   :  { %4184 = vpow2.f32 %v3062_v8 }
0x1503   :  { %v4179_v9 = vpop.eup %4178 }
0x1504   :  { %v4181_v60 = vpop.eup %4180  ;;  %v3070_v12 = vmul.f32 %v4179_v9, %v2032_v59 }
0x1505   :  { %v4183_v15 = vpop.eup %4182  ;;  %v3068_v62 = vmul.f32 %v4181_v60, %v2030_v61 }
0x1506   :  { %v3074_v17 = vadd.f32 %v3070_v12, %v4764_v46  ;;  %v3071_v1 = vmul.f32 %v4183_v15, %v2033_v11  ;;  %v4185_v10 = vpop.eup %4184 }
0x1507   :  { %v3072_v18 = vadd.f32 %v3068_v62, %v4766_v49  ;;  %v3069_v50 = vmul.f32 %v4185_v10, %v2031_v63 }
0x1508   :  { %3108 = vst [vmem:[#allocation16 + $0xd0] sm:$0xff] %v3074_v17  ;;  %v3075_v14 = vadd.f32 %v3071_v1, %v4769_v29 }
0x1509   :  { %3106 = vst [vmem:[#allocation16 + $0xc0] sm:$0xff] %v3072_v18  ;;  %v3073_v19 = vadd.f32 %v3069_v50, %v4772_v53 }
0x150a   :  { %3109 = vst [vmem:[#allocation16 + $0xd8] sm:$0xff] %v3075_v14 }
0x150b   :  { %3107 = vst [vmem:[#allocation16 + $0xc8] sm:$0xff] %v3073_v19 }
0x150c   :  { %4375 = shalt.err (!%p4372_p12)
}
0x150d   :  { %s4376_s13 = scalar_lea.hbm %s4837_s8, 4608 }
0x150e   :  { %p4377_p13 = scmp.ne.s32.totalorder %s4837_s8, %s4376_s13  ;;  %p4380_p0 = scmp.lt.u32.totalorder %s4376_s13, %s4837_s8 }
0x1510   :  { %p4382_p1 = pnand %p4380_p0, %p4377_p13 }
0x1512   :  { %4385 = shalt.err (!%p4382_p1)
}
0x1513   :  { %3131 = dma.vmem_to_hbm [thread:$0]  %s3126_s22, 4608, %s4837_s8, [#allocation4], %s4399_s15, %s4399_s15, %s4400_s16  }
0x1514   :  { %4396 = dma.done.wait [#allocation4], 4608  }
0x1515   :  { %4397 = vsyncadd [#allocation4], 4294962688 }
0x1516   :  { %3135 = vsyncpa [#allocation3], 1 }
0x1517   :  { %3136 = vsyncpa [#allocation6], 1 }
0x1518   :  { %3137 = vsyncpa [#allocation9], 1 }
0x1519   :  { %3138 = vsyncpa [#allocation12], 1 }
0x151a   :  { %3139 = vsyncpa [#allocation15], 1 }
0x151b   :  { %3140 = vsyncpa [#allocation4], 1 }

</bundles_post_ra>
